<compile_context>
chip_gen: v7x
topology: tpu7x:2x2x1
jax: 0.10.0
libtpu: 0.0.40
codegen_flags: <defaults>
</compile_context>

<pallas_src>
import functools
import math

import jax
import jax.numpy as jnp
from jax.experimental import pallas as pl
from jax.experimental.pallas import tpu as pltpu

# Logical (PyTorch) dims.
IN_DIM = 144
H1 = 128
H21 = 256
H22 = 512
H2 = H21 + H22          # fused fc21|fc22 width = 768
LATENT = 169


def _round_up(x, m):
    return (x + m - 1) // m * m


def _svae_kernel(
    x_ref, eps_ref,
    w1, b1, w2, b2, w31, b31, w32, b32,
    w41, b41, w42, b42, wphi, bphi,
    xloc_out, zloc_out, zlogscale_out,
):
    """Fused SVAE forward (encoder -> reparameterize -> decoder) on one batch tile."""

    def linear(h_bf16, w_ref, b_ref):
        # bf16 x bf16 MXU matmul with f32 accumulation; f32 bias add.
        return (
            jnp.dot(h_bf16, w_ref[...], preferred_element_type=jnp.float32)
            + b_ref[...]
        )

    def relu_bf16(a):
        # Single bf16 cast per intermediate: operands reach the MXU as bf16
        # anyway, but inter-layer VMEM footprint / vst traffic is halved.
        return jnp.maximum(a, 0.0).astype(jnp.bfloat16)

    x = x_ref[...].astype(jnp.bfloat16)

    # Encoder
    h1 = relu_bf16(linear(x, w1, b1))
    # fc21 / fc22 fused into a single 128x768 matmul; static slices are free.
    h2 = relu_bf16(linear(h1, w2, b2))
    h21 = h2[:, :H21]
    h22 = h2[:, H21:]
    h31 = relu_bf16(linear(h21, w31, b31))
    h32 = relu_bf16(linear(h22, w32, b32))
    z_loc = linear(h31, w41, b41)              # f32, (tile, 169)
    z_logscale = linear(h32, w42, b42)         # f32, (tile, 169)

    # Reparameterize (family='GAUSSIAN'): scale = sigmoid(exp(logscale)); z = eps*scale + loc
    scale = jax.nn.sigmoid(jnp.exp(z_logscale))
    z = eps_ref[...] * scale + z_loc

    # Decoder (Phi)
    x_loc = linear(z.astype(jnp.bfloat16), wphi, bphi)

    xloc_out[...] = x_loc
    zloc_out[...] = z_loc
    zlogscale_out[...] = z_logscale


def pack_params(params):
    """Fuse fc21/fc22 into one matmul and cast weights to bf16 (biases stay f32)."""
    (w1, b1, w21, b21, w22, b22, w31, b31, w32, b32,
     w41, b41, w42, b42, wphi, bphi) = params

    w2 = jnp.concatenate([w21, w22], axis=1)     # (128, 768)
    b2 = jnp.concatenate([b21, b22], axis=1)     # (1, 768)

    bf16 = lambda w: w.astype(jnp.bfloat16)
    return (bf16(w1), b1, bf16(w2), b2, bf16(w31), b31, bf16(w32), b32,
            bf16(w41), b41, bf16(w42), b42, bf16(wphi), bphi)


@functools.partial(jax.jit, static_argnames=("b_tile",))
def svae_forward(x, eps, packed_params, b_tile=512):
    """x: (B, 144) f32, eps: (B, 169) f32, packed_params from pack_params."""
    B = x.shape[0]

    # Pick a tile from a target step count: >= 2 steps whenever B allows it
    # (so the batch grid shards across both TensorCores on v7x and the next
    # tile's DMA pipelines), tiles capped at b_tile, and batch-pad waste
    # bounded to a handful of rows instead of up to tile-1.
    steps = max(2, 2 * math.ceil(B / (2 * b_tile)))
    eff_tile = min(b_tile, _round_up(max(1, math.ceil(B / steps)), 8))
    n_steps = pl.cdiv(B, eff_tile)
    B_pad = n_steps * eff_tile

    if B_pad != B:
        # Cheap fallback for awkward batch sizes; the common case is a no-op.
        x = jnp.pad(x, ((0, B_pad - B), (0, 0)))
        eps = jnp.pad(eps, ((0, B_pad - B), (0, 0)))

    grid = (n_steps,)

    def act_spec(feat):
        # Last block dim equals the full (logical) feature width -> legal even
        # though 144/169 are not multiples of 128; batch dim is a multiple of 8.
        return pl.BlockSpec((eff_tile, feat), lambda i: (i, 0))

    def w_spec(p):
        # Constant block index -> weight stays VMEM-resident across grid steps.
        return pl.BlockSpec(p.shape, lambda i: (0, 0))

    in_specs = [act_spec(IN_DIM), act_spec(LATENT)] + [w_spec(p) for p in packed_params]
    out_specs = (act_spec(IN_DIM), act_spec(LATENT), act_spec(LATENT))
    out_shapes = (
        jax.ShapeDtypeStruct((B_pad, IN_DIM), jnp.float32),   # x_loc
        jax.ShapeDtypeStruct((B_pad, LATENT), jnp.float32),   # z_loc
        jax.ShapeDtypeStruct((B_pad, LATENT), jnp.float32),   # z_logscale
    )

    flops = 2 * B_pad * (IN_DIM * H1 + H1 * H2 + H21 * H21 + H22 * H22
                         + H21 * LATENT + H22 * LATENT + LATENT * IN_DIM)
    weight_bytes = sum(int(p.size) * p.dtype.itemsize for p in packed_params)
    io_bytes = B_pad * (IN_DIM + LATENT + IN_DIM + 2 * LATENT) * 4
    cost = pl.CostEstimate(
        flops=flops,
        transcendentals=2 * B_pad * LATENT,   # exp + sigmoid per latent element
        bytes_accessed=weight_bytes + io_bytes,
    )

    x_loc, z_loc, z_logscale = pl.pallas_call(
        _svae_kernel,
        out_shape=out_shapes,
        grid=grid,
        in_specs=in_specs,
        out_specs=out_specs,
        compiler_params=pltpu.CompilerParams(
            dimension_semantics=("parallel",),     # shard batch grid across TCs on v7x
            vmem_limit_bytes=32 * 1024 * 1024,     # raise v5e's 16 MiB default scope
        ),
        cost_estimate=cost,
    )(x, eps, *packed_params)

    if B_pad != B:
        x_loc = x_loc[:B]
        z_loc = z_loc[:B]
        z_logscale = z_logscale[:B]
    return (x_loc, z_loc, z_logscale)


def init_linear(key, fan_in, fan_out):
    """Mimic torch.nn.Linear default init (uniform +/- 1/sqrt(fan_in)); W as (in, out)."""
    kw, kb = jax.random.split(key)
    bound = 1.0 / math.sqrt(fan_in)
    w = jax.random.uniform(kw, (fan_in, fan_out), jnp.float32, -bound, bound)
    b = jax.random.uniform(kb, (1, fan_out), jnp.float32, -bound, bound)
    return w, b


def make_params(key):
    keys = jax.random.split(key, 8)
    w1, b1 = init_linear(keys[0], IN_DIM, H1)          # fc1: 144 -> 128
    w21, b21 = init_linear(keys[1], H1, H21)           # fc21: 128 -> 256
    w22, b22 = init_linear(keys[2], H1, H22)           # fc22: 128 -> 512
    w31, b31 = init_linear(keys[3], H21, H21)          # fc31: 256 -> 256
    w32, b32 = init_linear(keys[4], H22, H22)          # fc32: 512 -> 512
    w41, b41 = init_linear(keys[5], H21, LATENT)       # fc41: 256 -> 169
    w42, b42 = init_linear(keys[6], H22, LATENT)       # fc42: 512 -> 169
    wphi, bphi = init_linear(keys[7], LATENT, IN_DIM)  # Phi: 169 -> 144
    return (w1, b1, w21, b21, w22, b22, w31, b31, w32, b32,
            w41, b41, w42, b42, wphi, bphi)


def reference_forward(x, eps, params):
    """Pure-JAX reference mirroring the kernel's bf16-weight / f32-accum precision."""
    (w1, b1, w21, b21, w22, b22, w31, b31, w32, b32,
     w41, b41, w42, b42, wphi, bphi) = params

    def lin(h, w, b):
        return jnp.dot(h.astype(jnp.bfloat16), w.astype(jnp.bfloat16),
                       preferred_element_type=jnp.float32) + b

    relu = lambda h: jnp.maximum(h, 0.0)
    h1 = relu(lin(x, w1, b1))
    h21 = relu(lin(h1, w21, b21))
    h22 = relu(lin(h1, w22, b22))
    h31 = relu(lin(h21, w31, b31))
    h32 = relu(lin(h22, w32, b32))
    z_loc = lin(h31, w41, b41)
    z_logscale = lin(h32, w42, b42)
    scale = jax.nn.sigmoid(jnp.exp(z_logscale))
    z = eps * scale + z_loc
    x_loc = lin(z, wphi, bphi)
    return x_loc, z_loc, z_logscale


if __name__ == "__main__":
    key = jax.random.PRNGKey(0)
    k_params, k_x, k_eps = jax.random.split(key, 3)

    B = 8
    params = make_params(k_params)
    packed_params = pack_params(params)
    x = jax.random.normal(k_x, (B, IN_DIM), jnp.float32)
    # Noise for the Gaussian reparameterization (torch.randn_like equivalent),
    # generated outside the kernel for determinism.
    eps = jax.random.normal(k_eps, (B, LATENT), jnp.float32)

    x_loc, z_loc, z_logscale = jax.block_until_ready(
        svae_forward(x, eps, packed_params))

    x_loc_ref, z_loc_ref, z_logscale_ref = reference_forward(x, eps, params)
    assert x_loc.shape == (B, IN_DIM)
    assert z_loc.shape == (B, LATENT)
    assert z_logscale.shape == (B, LATENT)
    # bf16 weights/activations at the MXU -> compare against a bf16-faithful
    # reference with a tolerance that absorbs accumulation-order differences.
    assert jnp.allclose(x_loc, x_loc_ref, atol=2e-2, rtol=2e-2)
    assert jnp.allclose(z_loc, z_loc_ref, atol=2e-2, rtol=2e-2)
    assert jnp.allclose(z_logscale, z_logscale_ref, atol=2e-2, rtol=2e-2)

    print("KERNEL_OK")
</pallas_src>

<mosaic_0001>
module attributes {stable_mosaic.version = 11 : i64} {
  func.func @_svae_kernel(%arg0: i32, %arg1: memref<8x144xf32, #tpu.memory_space<vmem>>, %arg2: memref<8x169xf32, #tpu.memory_space<vmem>>, %arg3: memref<144x128xbf16, #tpu.memory_space<vmem>>, %arg4: memref<1x128xf32, #tpu.memory_space<vmem>>, %arg5: memref<128x768xbf16, #tpu.memory_space<vmem>>, %arg6: memref<1x768xf32, #tpu.memory_space<vmem>>, %arg7: memref<256x256xbf16, #tpu.memory_space<vmem>>, %arg8: memref<1x256xf32, #tpu.memory_space<vmem>>, %arg9: memref<512x512xbf16, #tpu.memory_space<vmem>>, %arg10: memref<1x512xf32, #tpu.memory_space<vmem>>, %arg11: memref<256x169xbf16, #tpu.memory_space<vmem>>, %arg12: memref<1x169xf32, #tpu.memory_space<vmem>>, %arg13: memref<512x169xbf16, #tpu.memory_space<vmem>>, %arg14: memref<1x169xf32, #tpu.memory_space<vmem>>, %arg15: memref<169x144xbf16, #tpu.memory_space<vmem>>, %arg16: memref<1x144xf32, #tpu.memory_space<vmem>>, %arg17: memref<8x144xf32, #tpu.memory_space<vmem>>, %arg18: memref<8x169xf32, #tpu.memory_space<vmem>>, %arg19: memref<8x169xf32, #tpu.memory_space<vmem>>) attributes {dimension_semantics = [#tpu.dimension_semantics<parallel>], iteration_bounds = array<i64: 1>, scalar_prefetch = 0 : i64, scratch_operands = 0 : i64, tpu.core_type = #tpu.core_type<tc>, window_params = [{transform_indices = @transform_0, window_bounds = array<i64: 8, 144>}, {transform_indices = @transform_1, window_bounds = array<i64: 8, 169>}, {pipeline_mode = #tpu.pipeline_mode<synchronous>, transform_indices = @transform_2, window_bounds = array<i64: 144, 128>}, {pipeline_mode = #tpu.pipeline_mode<synchronous>, transform_indices = @transform_3, window_bounds = array<i64: 1, 128>}, {pipeline_mode = #tpu.pipeline_mode<synchronous>, transform_indices = @transform_4, window_bounds = array<i64: 128, 768>}, {pipeline_mode = #tpu.pipeline_mode<synchronous>, transform_indices = @transform_5, window_bounds = array<i64: 1, 768>}, {pipeline_mode = #tpu.pipeline_mode<synchronous>, transform_indices = @transform_6, window_bounds = array<i64: 256, 256>}, {pipeline_mode = #tpu.pipeline_mode<synchronous>, transform_indices = @transform_7, window_bounds = array<i64: 1, 256>}, {pipeline_mode = #tpu.pipeline_mode<synchronous>, transform_indices = @transform_8, window_bounds = array<i64: 512, 512>}, {pipeline_mode = #tpu.pipeline_mode<synchronous>, transform_indices = @transform_9, window_bounds = array<i64: 1, 512>}, {pipeline_mode = #tpu.pipeline_mode<synchronous>, transform_indices = @transform_10, window_bounds = array<i64: 256, 169>}, {pipeline_mode = #tpu.pipeline_mode<synchronous>, transform_indices = @transform_11, window_bounds = array<i64: 1, 169>}, {pipeline_mode = #tpu.pipeline_mode<synchronous>, transform_indices = @transform_12, window_bounds = array<i64: 512, 169>}, {pipeline_mode = #tpu.pipeline_mode<synchronous>, transform_indices = @transform_13, window_bounds = array<i64: 1, 169>}, {pipeline_mode = #tpu.pipeline_mode<synchronous>, transform_indices = @transform_14, window_bounds = array<i64: 169, 144>}, {pipeline_mode = #tpu.pipeline_mode<synchronous>, transform_indices = @transform_15, window_bounds = array<i64: 1, 144>}, {transform_indices = @transform_16, window_bounds = array<i64: 8, 144>}, {transform_indices = @transform_17, window_bounds = array<i64: 8, 169>}, {transform_indices = @transform_18, window_bounds = array<i64: 8, 169>}]} {
    %c0 = arith.constant 0 : index
    %c0_0 = arith.constant 0 : index
    %0 = vector.load %arg1[%c0, %c0_0] : memref<8x144xf32, #tpu.memory_space<vmem>>, vector<8x144xf32>
    %1 = arith.truncf %0 : vector<8x144xf32> to vector<8x144xbf16>
    %c0_1 = arith.constant 0 : index
    %c0_2 = arith.constant 0 : index
    %2 = vector.load %arg3[%c0_1, %c0_2] : memref<144x128xbf16, #tpu.memory_space<vmem>>, vector<144x128xbf16>
    %cst = arith.constant dense<0.000000e+00> : vector<8x128xf32>
    %3 = tpu.matmul %1, %2, %cst {dimension_numbers = #tpu.dot_dimension_numbers<[1], [0], [0], [1], [0, 0, 1, 1], [], []>} : vector<8x144xbf16>, vector<144x128xbf16>, vector<8x128xf32> -> vector<8x128xf32>
    %c0_3 = arith.constant 0 : index
    %c0_4 = arith.constant 0 : index
    %4 = vector.load %arg4[%c0_3, %c0_4] : memref<1x128xf32, #tpu.memory_space<vmem>>, vector<1x128xf32>
    %5 = vector.broadcast %4 : vector<1x128xf32> to vector<8x128xf32>
    %6 = arith.addf %3, %5 : vector<8x128xf32>
    %cst_5 = arith.constant 0.000000e+00 : f32
    %7 = vector.broadcast %cst_5 : f32 to vector<8x128xf32>
    %8 = arith.maximumf %6, %7 : vector<8x128xf32>
    %9 = arith.truncf %8 : vector<8x128xf32> to vector<8x128xbf16>
    %c0_6 = arith.constant 0 : index
    %c0_7 = arith.constant 0 : index
    %10 = vector.load %arg5[%c0_6, %c0_7] : memref<128x768xbf16, #tpu.memory_space<vmem>>, vector<128x768xbf16>
    %cst_8 = arith.constant dense<0.000000e+00> : vector<8x768xf32>
    %11 = tpu.matmul %9, %10, %cst_8 {dimension_numbers = #tpu.dot_dimension_numbers<[1], [0], [0], [1], [0, 0, 1, 1], [], []>} : vector<8x128xbf16>, vector<128x768xbf16>, vector<8x768xf32> -> vector<8x768xf32>
    %c0_9 = arith.constant 0 : index
    %c0_10 = arith.constant 0 : index
    %12 = vector.load %arg6[%c0_9, %c0_10] : memref<1x768xf32, #tpu.memory_space<vmem>>, vector<1x768xf32>
    %13 = vector.broadcast %12 : vector<1x768xf32> to vector<8x768xf32>
    %14 = arith.addf %11, %13 : vector<8x768xf32>
    %cst_11 = arith.constant 0.000000e+00 : f32
    %15 = vector.broadcast %cst_11 : f32 to vector<8x768xf32>
    %16 = arith.maximumf %14, %15 : vector<8x768xf32>
    %17 = arith.truncf %16 : vector<8x768xf32> to vector<8x768xbf16>
    %18 = vector.extract_strided_slice %17 {offsets = [0, 0], sizes = [8, 256], strides = [1, 1]} : vector<8x768xbf16> to vector<8x256xbf16>
    %19 = vector.extract_strided_slice %17 {offsets = [0, 256], sizes = [8, 512], strides = [1, 1]} : vector<8x768xbf16> to vector<8x512xbf16>
    %c0_12 = arith.constant 0 : index
    %c0_13 = arith.constant 0 : index
    %20 = vector.load %arg7[%c0_12, %c0_13] : memref<256x256xbf16, #tpu.memory_space<vmem>>, vector<256x256xbf16>
    %cst_14 = arith.constant dense<0.000000e+00> : vector<8x256xf32>
    %21 = tpu.matmul %18, %20, %cst_14 {dimension_numbers = #tpu.dot_dimension_numbers<[1], [0], [0], [1], [0, 0, 1, 1], [], []>} : vector<8x256xbf16>, vector<256x256xbf16>, vector<8x256xf32> -> vector<8x256xf32>
    %c0_15 = arith.constant 0 : index
    %c0_16 = arith.constant 0 : index
    %22 = vector.load %arg8[%c0_15, %c0_16] : memref<1x256xf32, #tpu.memory_space<vmem>>, vector<1x256xf32>
    %23 = vector.broadcast %22 : vector<1x256xf32> to vector<8x256xf32>
    %24 = arith.addf %21, %23 : vector<8x256xf32>
    %cst_17 = arith.constant 0.000000e+00 : f32
    %25 = vector.broadcast %cst_17 : f32 to vector<8x256xf32>
    %26 = arith.maximumf %24, %25 : vector<8x256xf32>
    %27 = arith.truncf %26 : vector<8x256xf32> to vector<8x256xbf16>
    %c0_18 = arith.constant 0 : index
    %c0_19 = arith.constant 0 : index
    %28 = vector.load %arg9[%c0_18, %c0_19] : memref<512x512xbf16, #tpu.memory_space<vmem>>, vector<512x512xbf16>
    %cst_20 = arith.constant dense<0.000000e+00> : vector<8x512xf32>
    %29 = tpu.matmul %19, %28, %cst_20 {dimension_numbers = #tpu.dot_dimension_numbers<[1], [0], [0], [1], [0, 0, 1, 1], [], []>} : vector<8x512xbf16>, vector<512x512xbf16>, vector<8x512xf32> -> vector<8x512xf32>
    %c0_21 = arith.constant 0 : index
    %c0_22 = arith.constant 0 : index
    %30 = vector.load %arg10[%c0_21, %c0_22] : memref<1x512xf32, #tpu.memory_space<vmem>>, vector<1x512xf32>
    %31 = vector.broadcast %30 : vector<1x512xf32> to vector<8x512xf32>
    %32 = arith.addf %29, %31 : vector<8x512xf32>
    %cst_23 = arith.constant 0.000000e+00 : f32
    %33 = vector.broadcast %cst_23 : f32 to vector<8x512xf32>
    %34 = arith.maximumf %32, %33 : vector<8x512xf32>
    %35 = arith.truncf %34 : vector<8x512xf32> to vector<8x512xbf16>
    %c0_24 = arith.constant 0 : index
    %c0_25 = arith.constant 0 : index
    %36 = vector.load %arg11[%c0_24, %c0_25] : memref<256x169xbf16, #tpu.memory_space<vmem>>, vector<256x169xbf16>
    %cst_26 = arith.constant dense<0.000000e+00> : vector<8x169xf32>
    %37 = tpu.matmul %27, %36, %cst_26 {dimension_numbers = #tpu.dot_dimension_numbers<[1], [0], [0], [1], [0, 0, 1, 1], [], []>} : vector<8x256xbf16>, vector<256x169xbf16>, vector<8x169xf32> -> vector<8x169xf32>
    %c0_27 = arith.constant 0 : index
    %c0_28 = arith.constant 0 : index
    %38 = vector.load %arg12[%c0_27, %c0_28] : memref<1x169xf32, #tpu.memory_space<vmem>>, vector<1x169xf32>
    %39 = vector.broadcast %38 : vector<1x169xf32> to vector<8x169xf32>
    %40 = arith.addf %37, %39 : vector<8x169xf32>
    %c0_29 = arith.constant 0 : index
    %c0_30 = arith.constant 0 : index
    %41 = vector.load %arg13[%c0_29, %c0_30] : memref<512x169xbf16, #tpu.memory_space<vmem>>, vector<512x169xbf16>
    %cst_31 = arith.constant dense<0.000000e+00> : vector<8x169xf32>
    %42 = tpu.matmul %35, %41, %cst_31 {dimension_numbers = #tpu.dot_dimension_numbers<[1], [0], [0], [1], [0, 0, 1, 1], [], []>} : vector<8x512xbf16>, vector<512x169xbf16>, vector<8x169xf32> -> vector<8x169xf32>
    %c0_32 = arith.constant 0 : index
    %c0_33 = arith.constant 0 : index
    %43 = vector.load %arg14[%c0_32, %c0_33] : memref<1x169xf32, #tpu.memory_space<vmem>>, vector<1x169xf32>
    %44 = vector.broadcast %43 : vector<1x169xf32> to vector<8x169xf32>
    %45 = arith.addf %42, %44 : vector<8x169xf32>
    %46 = math.exp %45 : vector<8x169xf32>
    %47 = arith.negf %46 : vector<8x169xf32>
    %48 = math.exp %47 : vector<8x169xf32>
    %cst_34 = arith.constant 1.000000e+00 : f32
    %49 = vector.broadcast %cst_34 : f32 to vector<8x169xf32>
    %50 = arith.addf %49, %48 : vector<8x169xf32>
    %51 = arith.divf %49, %50 : vector<8x169xf32>
    %c0_35 = arith.constant 0 : index
    %c0_36 = arith.constant 0 : index
    %52 = vector.load %arg2[%c0_35, %c0_36] : memref<8x169xf32, #tpu.memory_space<vmem>>, vector<8x169xf32>
    %53 = arith.mulf %52, %51 : vector<8x169xf32>
    %54 = arith.addf %53, %40 : vector<8x169xf32>
    %55 = arith.truncf %54 : vector<8x169xf32> to vector<8x169xbf16>
    %c0_37 = arith.constant 0 : index
    %c0_38 = arith.constant 0 : index
    %56 = vector.load %arg15[%c0_37, %c0_38] : memref<169x144xbf16, #tpu.memory_space<vmem>>, vector<169x144xbf16>
    %cst_39 = arith.constant dense<0.000000e+00> : vector<8x144xf32>
    %57 = tpu.matmul %55, %56, %cst_39 {dimension_numbers = #tpu.dot_dimension_numbers<[1], [0], [0], [1], [0, 0, 1, 1], [], []>} : vector<8x169xbf16>, vector<169x144xbf16>, vector<8x144xf32> -> vector<8x144xf32>
    %c0_40 = arith.constant 0 : index
    %c0_41 = arith.constant 0 : index
    %58 = vector.load %arg16[%c0_40, %c0_41] : memref<1x144xf32, #tpu.memory_space<vmem>>, vector<1x144xf32>
    %59 = vector.broadcast %58 : vector<1x144xf32> to vector<8x144xf32>
    %60 = arith.addf %57, %59 : vector<8x144xf32>
    %c0_42 = arith.constant 0 : index
    %c0_43 = arith.constant 0 : index
    %61 = vector.load %arg17[%c0_42, %c0_43] : memref<8x144xf32, #tpu.memory_space<vmem>>, vector<8x144xf32>
    tpu.vector_store %arg17[%c0_42, %c0_43], %60 {strides = array<i32>} : memref<8x144xf32, #tpu.memory_space<vmem>>, vector<8x144xf32>,
    %c0_44 = arith.constant 0 : index
    %c0_45 = arith.constant 0 : index
    %62 = vector.load %arg18[%c0_44, %c0_45] : memref<8x169xf32, #tpu.memory_space<vmem>>, vector<8x169xf32>
    tpu.vector_store %arg18[%c0_44, %c0_45], %40 {strides = array<i32>} : memref<8x169xf32, #tpu.memory_space<vmem>>, vector<8x169xf32>,
    %c0_46 = arith.constant 0 : index
    %c0_47 = arith.constant 0 : index
    %63 = vector.load %arg19[%c0_46, %c0_47] : memref<8x169xf32, #tpu.memory_space<vmem>>, vector<8x169xf32>
    tpu.vector_store %arg19[%c0_46, %c0_47], %45 {strides = array<i32>} : memref<8x169xf32, #tpu.memory_space<vmem>>, vector<8x169xf32>,
    return
  }
  func.func @transform_0(%arg0: i32) -> (i32, i32) {
    %c0_i32 = arith.constant 0 : i32
    %c0_i32_0 = arith.constant 0 : i32
    return %arg0, %c0_i32 : i32, i32
  }
  func.func @transform_1(%arg0: i32) -> (i32, i32) {
    %c0_i32 = arith.constant 0 : i32
    %c0_i32_0 = arith.constant 0 : i32
    return %arg0, %c0_i32 : i32, i32
  }
  func.func @transform_2(%arg0: i32) -> (i32, i32) {
    %c0_i32 = arith.constant 0 : i32
    %c0_i32_0 = arith.constant 0 : i32
    %c0_i32_1 = arith.constant 0 : i32
    return %c0_i32, %c0_i32_0 : i32, i32
  }
  func.func @transform_3(%arg0: i32) -> (i32, i32) {
    %c0_i32 = arith.constant 0 : i32
    %c0_i32_0 = arith.constant 0 : i32
    %c0_i32_1 = arith.constant 0 : i32
    return %c0_i32, %c0_i32_0 : i32, i32
  }
  func.func @transform_4(%arg0: i32) -> (i32, i32) {
    %c0_i32 = arith.constant 0 : i32
    %c0_i32_0 = arith.constant 0 : i32
    %c0_i32_1 = arith.constant 0 : i32
    return %c0_i32, %c0_i32_0 : i32, i32
  }
  func.func @transform_5(%arg0: i32) -> (i32, i32) {
    %c0_i32 = arith.constant 0 : i32
    %c0_i32_0 = arith.constant 0 : i32
    %c0_i32_1 = arith.constant 0 : i32
    return %c0_i32, %c0_i32_0 : i32, i32
  }
  func.func @transform_6(%arg0: i32) -> (i32, i32) {
    %c0_i32 = arith.constant 0 : i32
    %c0_i32_0 = arith.constant 0 : i32
    %c0_i32_1 = arith.constant 0 : i32
    return %c0_i32, %c0_i32_0 : i32, i32
  }
  func.func @transform_7(%arg0: i32) -> (i32, i32) {
    %c0_i32 = arith.constant 0 : i32
    %c0_i32_0 = arith.constant 0 : i32
    %c0_i32_1 = arith.constant 0 : i32
    return %c0_i32, %c0_i32_0 : i32, i32
  }
  func.func @transform_8(%arg0: i32) -> (i32, i32) {
    %c0_i32 = arith.constant 0 : i32
    %c0_i32_0 = arith.constant 0 : i32
    %c0_i32_1 = arith.constant 0 : i32
    return %c0_i32, %c0_i32_0 : i32, i32
  }
  func.func @transform_9(%arg0: i32) -> (i32, i32) {
    %c0_i32 = arith.constant 0 : i32
    %c0_i32_0 = arith.constant 0 : i32
    %c0_i32_1 = arith.constant 0 : i32
    return %c0_i32, %c0_i32_0 : i32, i32
  }
  func.func @transform_10(%arg0: i32) -> (i32, i32) {
    %c0_i32 = arith.constant 0 : i32
    %c0_i32_0 = arith.constant 0 : i32
    %c0_i32_1 = arith.constant 0 : i32
    return %c0_i32, %c0_i32_0 : i32, i32
  }
  func.func @transform_11(%arg0: i32) -> (i32, i32) {
    %c0_i32 = arith.constant 0 : i32
    %c0_i32_0 = arith.constant 0 : i32
    %c0_i32_1 = arith.constant 0 : i32
    return %c0_i32, %c0_i32_0 : i32, i32
  }
  func.func @transform_12(%arg0: i32) -> (i32, i32) {
    %c0_i32 = arith.constant 0 : i32
    %c0_i32_0 = arith.constant 0 : i32
    %c0_i32_1 = arith.constant 0 : i32
    return %c0_i32, %c0_i32_0 : i32, i32
  }
  func.func @transform_13(%arg0: i32) -> (i32, i32) {
    %c0_i32 = arith.constant 0 : i32
    %c0_i32_0 = arith.constant 0 : i32
    %c0_i32_1 = arith.constant 0 : i32
    return %c0_i32, %c0_i32_0 : i32, i32
  }
  func.func @transform_14(%arg0: i32) -> (i32, i32) {
    %c0_i32 = arith.constant 0 : i32
    %c0_i32_0 = arith.constant 0 : i32
    %c0_i32_1 = arith.constant 0 : i32
    return %c0_i32, %c0_i32_0 : i32, i32
  }
  func.func @transform_15(%arg0: i32) -> (i32, i32) {
    %c0_i32 = arith.constant 0 : i32
    %c0_i32_0 = arith.constant 0 : i32
    %c0_i32_1 = arith.constant 0 : i32
    return %c0_i32, %c0_i32_0 : i32, i32
  }
  func.func @transform_16(%arg0: i32) -> (i32, i32) {
    %c0_i32 = arith.constant 0 : i32
    %c0_i32_0 = arith.constant 0 : i32
    return %arg0, %c0_i32 : i32, i32
  }
  func.func @transform_17(%arg0: i32) -> (i32, i32) {
    %c0_i32 = arith.constant 0 : i32
    %c0_i32_0 = arith.constant 0 : i32
    return %arg0, %c0_i32 : i32, i32
  }
  func.func @transform_18(%arg0: i32) -> (i32, i32) {
    %c0_i32 = arith.constant 0 : i32
    %c0_i32_0 = arith.constant 0 : i32
    return %arg0, %c0_i32 : i32, i32
  }
}

</mosaic_0001>

<bundles_post_ra>
// kernel: svae_forward.1
= control target key start
LH: loop header
LB: loop body
LE: loop exit
PB: predicated region body
PF: predicated region fallthrough
CT: control target
= control target key end

     0   :  { %s5044_s0 = inlined_call_operand.vmem [shape: f32[8,144], index: 0, kind: input, shape index: {}]   ;;  %s5045_s1 = inlined_call_operand.vmem [shape: f32[8,169], index: 1, kind: input, shape index: {}]   ;;  %s5046_s2 = inlined_call_operand.hbm [shape: bf16[144,128], index: 2, kind: input, shape index: {}]   ;;  %s5047_s3 = inlined_call_operand.vmem [shape: f32[1,128], index: 3, kind: input, shape index: {}]   ;;  %s5048_s4 = inlined_call_operand.vmem [shape: bf16[128,768], index: 4, kind: input, shape index: {}]   ;;  %s5049_s5 = inlined_call_operand.vmem [shape: f32[1,768], index: 5, kind: input, shape index: {}]   ;;  %s5050_s6 = inlined_call_operand.hbm [shape: bf16[256,256], index: 6, kind: input, shape index: {}]   ;;  %s5051_s7 = inlined_call_operand.vmem [shape: f32[1,256], index: 7, kind: input, shape index: {}]   ;;  %s5052_s8 = inlined_call_operand.vmem [shape: bf16[512,512], index: 8, kind: input, shape index: {}]   ;;  %s5053_s9 = inlined_call_operand.vmem [shape: f32[1,512], index: 9, kind: input, shape index: {}]   ;;  %s5054_s10 = inlined_call_operand.vmem [shape: bf16[256,169], index: 10, kind: input, shape index: {}]   ;;  %s5055_s11 = inlined_call_operand.vmem [shape: f32[1,169], index: 11, kind: input, shape index: {}]   ;;  %s5056_s12 = inlined_call_operand.vmem [shape: bf16[512,169], index: 12, kind: input, shape index: {}]   ;;  %s5057_s13 = inlined_call_operand.vmem [shape: f32[1,169], index: 13, kind: input, shape index: {}]   ;;  %s5058_s14 = inlined_call_operand.vmem [shape: bf16[169,144], index: 14, kind: input, shape index: {}]   ;;  %s5059_s15 = inlined_call_operand.vmem [shape: f32[1,144], index: 15, kind: input, shape index: {}]   ;;  %s5060_s16 = inlined_call_operand.hbm [shape: f32[8,144], index: 16, kind: output, shape index: {0}]   ;;  %s5061_s17 = inlined_call_operand.hbm [shape: f32[8,169], index: 17, kind: output, shape index: {1}]   ;;  %s5062_s18 = inlined_call_operand.hbm [shape: f32[8,169], index: 18, kind: output, shape index: {2}]  }
   0x1   :  { %5067 = sst [smem:[#allocation15_spill]] %s5044_s0 }
   0x2   :  { %5068 = sst [smem:[#allocation16_spill]] %s5045_s1 }
   0x3   :  { %5069 = sst [smem:[#allocation17_spill]] %s5046_s2 }
   0x4   :  { %5070 = sst [smem:[#allocation18_spill]] %s5060_s16 }
   0x5   :  { %24 = vsyncpa [#allocation3], 0 }
   0x6   :  { %25 = vsyncpa [#allocation6], 0 }
   0x7   :  { %26 = vsyncpa [#allocation4], 0 }
   0x8   :  { %27 = vsyncpa [#allocation9], 0  ;;  %s3872_s27 = smov [#allocation2]   ;;  %s5071_s0 = sld [smem:[#allocation17_spill]] }
   0x9   :  { %s37_s28 = sshll.u32 %s3872_s27, 4  ;;  %s38_s28 = int_to_ptr.vmem [resolvable:$true] %s37_s28 }
   0xe   :  { %s3754_s19 = scalar_lea.hbm %s5071_s0, 1152 }
   0xf   :  { %p3755_p0 = scmp.ne.s32.totalorder %s5071_s0, %s3754_s19  ;;  %p3758_p1 = scmp.lt.u32.totalorder %s3754_s19, %s5071_s0 }
  0x11   :  { %p3760_p2 = pnand %p3758_p1, %p3755_p0 }
  0x13   :  { %3763 = shalt.err (!%p3760_p2)
}
  0x14   :  { %s3764_s2 = scalar_lea.vmem %s38_s28, 1152  ;;  %p3769_p4 = scmp.lt.s32.totalorder %s38_s28, %s38_s28 }
  0x15   :  { %p3765_p3 = scmp.ne.s32.totalorder %s38_s28, %s3764_s2  ;;  %p3770_p5 = scmp.lt.s32.totalorder %s3764_s2, %s3764_s2 }
  0x17   :  { %p3771_p6 = por %p3770_p5, %p3769_p4 }
  0x19   :  { %p3772_p7 = pnand %p3771_p6, %p3765_p3 }
  0x1b   :  { %3775 = shalt.err (!%p3772_p7)
}
  0x1c   :  { %s3873_s23 = smov 64   ;;  %s3874_s24 = smov 4  }
  0x1d   :  { %43 = dma.hbm_to_vmem [thread:$0]  %s5071_s0, 1152, %s38_s28, [#allocation3], %s3873_s23, %s3873_s23, %s3874_s24  }
  0x1e   :  { %s3875_s27 = smov [#allocation5]   ;;  %s3776_s1 = scalar_lea.hbm %s5050_s6, 4096 }
  0x1f   :  { %s55_s29 = sshll.u32 %s3875_s27, 4  ;;  %p3777_p8 = scmp.ne.s32.totalorder %s5050_s6, %s3776_s1  ;;  %s56_s29 = int_to_ptr.vmem [resolvable:$true] %s55_s29 }
  0x20   :  { %p3780_p9 = scmp.lt.u32.totalorder %s3776_s1, %s5050_s6 }
  0x22   :  { %p3782_p10 = pnand %p3780_p9, %p3777_p8 }
  0x24   :  { %3785 = shalt.err (!%p3782_p10)
}
  0x25   :  { %s3786_s16 = scalar_lea.vmem %s56_s29, 4096  ;;  %p3791_p12 = scmp.lt.s32.totalorder %s56_s29, %s56_s29 }
  0x26   :  { %p3787_p11 = scmp.ne.s32.totalorder %s56_s29, %s3786_s16  ;;  %p3792_p13 = scmp.lt.s32.totalorder %s3786_s16, %s3786_s16 }
  0x28   :  { %p3793_p0 = por %p3792_p13, %p3791_p12 }
  0x2a   :  { %p3794_p1 = pnand %p3793_p0, %p3787_p11 }
  0x2c   :  { %3797 = shalt.err (!%p3794_p1)
}
  0x2d   :  { %s3876_s28 = smov 128   ;;  %s3877_s0 = smov 8  }
  0x2e   :  { %61 = dma.hbm_to_vmem [thread:$0]  %s5050_s6, 4096, %s56_s29, [#allocation6], %s3876_s28, %s3876_s28, %s3877_s0  }
  0x2f   :  { %3864 = dma.done.wait [#allocation3], 1152  }
  0x30   :  { %3865 = vsyncadd [#allocation3], 4294966144 }
  0x31   :  { %3866 = dma.done.wait [#allocation6], 4096  }
  0x32   :  { %3867 = vsyncadd [#allocation6], 4294963200  ;;  %v3878_v0 = vmov 0   ;;  %v3244_v1 = vld [vmem:[#allocation2] sm:$0xff]   ;;  %v3245_v2 = vld [vmem:[#allocation2 + $0x8] sm:$0xff]   ;;  %s5072_s25 = sld [smem:[#allocation15_spill]] }
  0x33   :  { %174 = vmatprep.subr.bf16.mxu0 %v3878_v0  ;;  %609 = vmatprep.mubr.bf16.mxu1 %v3878_v0  ;;  %v3246_v3 = vld [vmem:[#allocation2 + $0x10] sm:$0xff]   ;;  %vm170_vm0 = vcmask 130048   ;;  %v3247_v5 = vld [vmem:[#allocation2 + $0x18] sm:$0xff]   ;;  %v3256_v7 = vld [vmem:[%s5048_s4 + $0xc] ss:$24 sps:$4 sm:$0xff]   ;;  %vm2771_vm1 = vcmask 334848  }
  0x34   :  { %175 = vmatpush1.bf16.msra.mxu0 %v3244_v1  ;;  %v3258_v8 = vld [vmem:[%s5048_s4 + $0x8] ss:$24 sps:$4 sm:$0xff]   ;;  %577 = vmatprep.subr.bf16.mxu1 %v3256_v7  ;;  %v3262_v10 = vld [vmem:[%s5048_s4 + $0x3c] ss:$24 sps:$4 sm:$0xff]   ;;  %v3264_v11 = vld [vmem:[%s5048_s4 + $0x38] ss:$24 sps:$4 sm:$0xff]  }
  0x35   :  { %176 = vmatprep.subr.bf16.mxu0 %v3878_v0  ;;  %v3248_v9 = vld [vmem:[#allocation2 + $0x20] sm:$0xff]   ;;  %578 = vmatpush1.bf16.msra.mxu1 %v3258_v8  ;;  %v3249_v13 = vld [vmem:[#allocation2 + $0x28] sm:$0xff]   ;;  %v3274_v15 = vld [vmem:[%s5048_s4 + $0x9c] ss:$24 sps:$4 sm:$0xff]   ;;  %vm2775_vm2 = vcmask 1043456   ;;  %vm2776_vm3 = vcmask 1044480  }
  0x36   :  { %579 = vmatprep.subr.bf16.mxu1 %v3262_v10  ;;  %v3268_v12 = vld [vmem:[%s5048_s4 + $0x6c] ss:$24 sps:$4 sm:$0xff]   ;;  %v3270_v14 = vld [vmem:[%s5048_s4 + $0x68] ss:$24 sps:$4 sm:$0xff]   ;;  %v3250_v16 = vld [vmem:[#allocation2 + $0x30] sm:$0xff]   ;;  %s5073_s2 = sld [smem:[#allocation16_spill]] }
  0x37   :  { %v3276_v17 = vld [vmem:[%s5048_s4 + $0x98] ss:$24 sps:$4 sm:$0xff]   ;;  %v3280_v18 = vld [vmem:[%s5048_s4 + $0xcc] ss:$24 sps:$4 sm:$0xff]   ;;  %v3282_v20 = vld [vmem:[%s5048_s4 + $0xc8] ss:$24 sps:$4 sm:$0xff]  }
  0x38   :  { %177 = vmatpush1.bf16.msra.mxu0 %v3245_v2  ;;  %v88_v4 = vld [vmem:[%s5072_s25 + $0x8] sm:$0xff]  ;;  %v3251_v19 = vld [vmem:[#allocation2 + $0x38] sm:$0xff]   ;;  %v3252_v22 = vld [vmem:[#allocation2 + $0x40] sm:$0xff]   ;;  %s3880_s23 = smov [#allocation8]  }
  0x39   :  { %178 = vmatprep.subr.bf16.mxu0 %v3878_v0  ;;  %v90_v6 = vpack.c.bf16 %v88_v4, %v88_v4  ;;  %580 = vmatpush1.bf16.msra.mxu1 %v3264_v11  ;;  %v3286_v21 = vld [vmem:[%s5048_s4 + $0xfc] ss:$24 sps:$4 sm:$0xff]   ;;  %v87_v23 = vld [vmem:[%s5072_s25] sm:$0xff]  ;;  %v3288_v24 = vld [vmem:[%s5048_s4 + $0xf8] ss:$24 sps:$4 sm:$0xff]   ;;  %s2848_s24 = sshll.u32 %s3880_s23, 4  ;;  %s2849_s24 = int_to_ptr.vmem [resolvable:$true] %s2848_s24 }
  0x3a   :  { %581 = vmatprep.subr.bf16.mxu1 %v3268_v12  ;;  %v3255_v25 = vld [vmem:[%s5048_s4 + $0x4] ss:$24 sps:$4 sm:$0xff]   ;;  %v3253_v27 = vld [vmem:[%s5048_s4] ss:$24 sps:$4 sm:$0xff]   ;;  %v89_v28 = vpack.c.bf16 %v87_v23, %v87_v23  ;;  %v3261_v29 = vld [vmem:[%s5048_s4 + $0x34] ss:$24 sps:$4 sm:$0xff]   ;;  %p3803_p3 = scmp.lt.s32.totalorder %s2849_s24, %s2849_s24 }
  0x3b   :  { %2885 = vmatprep.mubr.msk.bf16.mxu0 %vm170_vm0, %v90_v6  ;;  %v3292_v26 = vld [vmem:[%s5048_s4 + $0x12c] ss:$24 sps:$4 sm:$0xff]   ;;  %v3259_v30 = vld [vmem:[%s5048_s4 + $0x30] ss:$24 sps:$4 sm:$0xff]   ;;  %v3265_v32 = vld [vmem:[%s5048_s4 + $0x60] ss:$24 sps:$4 sm:$0xff]  }
  0x3c   :  { %179 = vmatpush1.bf16.msra.mxu0 %v3246_v3  ;;  %v3267_v31 = vld [vmem:[%s5048_s4 + $0x64] ss:$24 sps:$4 sm:$0xff]   ;;  %v3273_v33 = vld [vmem:[%s5048_s4 + $0x94] ss:$24 sps:$4 sm:$0xff]   ;;  %v3271_v34 = vld [vmem:[%s5048_s4 + $0x90] ss:$24 sps:$4 sm:$0xff]  }
  0x3d   :  { %180 = vmatprep.subr.bf16.mxu0 %v3878_v0  ;;  %582 = vmatpush1.bf16.msra.mxu1 %v3270_v14  ;;  %v3279_v35 = vld [vmem:[%s5048_s4 + $0xc4] ss:$24 sps:$4 sm:$0xff]   ;;  %v3277_v36 = vld [vmem:[%s5048_s4 + $0xc0] ss:$24 sps:$4 sm:$0xff]   ;;  %v3285_v37 = vld [vmem:[%s5048_s4 + $0xf4] ss:$24 sps:$4 sm:$0xff]  }
  0x3e   :  { %583 = vmatprep.subr.bf16.mxu1 %v3274_v15  ;;  %v3283_v38 = vld [vmem:[%s5048_s4 + $0xf0] ss:$24 sps:$4 sm:$0xff]   ;;  %v3291_v39 = vld [vmem:[%s5048_s4 + $0x124] ss:$24 sps:$4 sm:$0xff]   ;;  %v3289_v40 = vld [vmem:[%s5048_s4 + $0x120] ss:$24 sps:$4 sm:$0xff]  }
  0x3f   :  { %v3294_v41 = vld [vmem:[%s5048_s4 + $0x128] ss:$24 sps:$4 sm:$0xff]   ;;  %v3297_v42 = vld [vmem:[%s5048_s4 + $0x154] ss:$24 sps:$4 sm:$0xff]   ;;  %v3300_v45 = vld [vmem:[%s5048_s4 + $0x158] ss:$24 sps:$4 sm:$0xff]  }
  0x40   :  { %181 = vmatpush1.bf16.msra.mxu0 %v3247_v5  ;;  %v3295_v43 = vld [vmem:[%s5048_s4 + $0x150] ss:$24 sps:$4 sm:$0xff]   ;;  %v3298_v44 = vld [vmem:[%s5048_s4 + $0x15c] ss:$24 sps:$4 sm:$0xff]   ;;  %v2875_v48 = vld [vmem:[%s5047_s3] ss:$0 sm:$0xff] }
  0x41   :  { %182 = vmatprep.subr.bf16.mxu0 %v3878_v0  ;;  %584 = vmatpush1.bf16.msra.mxu1 %v3276_v17  ;;  %v3303_v46 = vld [vmem:[%s5048_s4 + $0x14] ss:$24 sps:$4 sm:$0xff]   ;;  %v3301_v55 = vld [vmem:[%s5048_s4 + $0x10] ss:$24 sps:$4 sm:$0xff]   ;;  %v3306_v57 = vld [vmem:[%s5048_s4 + $0x44] ss:$24 sps:$4 sm:$0xff]  }
  0x42   :  { %585 = vmatprep.subr.bf16.mxu1 %v3280_v18  ;;  %v3327_v47 = vld [vmem:[#allocation5 + $0x4] ss:$8 sps:$4 sm:$0xff]   ;;  %v3325_v58 = vld [vmem:[#allocation5] ss:$8 sps:$4 sm:$0xff]   ;;  %v3333_v59 = vld [vmem:[#allocation5 + $0x14] ss:$8 sps:$4 sm:$0xff]  }
  0x43   :  { %v3304_v60 = vld [vmem:[%s5048_s4 + $0x40] ss:$24 sps:$4 sm:$0xff]   ;;  %v3309_v61 = vld [vmem:[%s5048_s4 + $0x74] ss:$24 sps:$4 sm:$0xff]   ;;  %v3307_v1 = vld [vmem:[%s5048_s4 + $0x70] ss:$24 sps:$4 sm:$0xff]  }
  0x44   :  { %183 = vmatpush1.bf16.msra.mxu0 %v3248_v9  ;;  %v3331_v62 = vld [vmem:[#allocation5 + $0x10] ss:$8 sps:$4 sm:$0xff]   ;;  %v3339_v63 = vld [vmem:[#allocation5 + $0x24] ss:$8 sps:$4 sm:$0xff]   ;;  %v3312_v2 = vld [vmem:[%s5048_s4 + $0xa4] ss:$24 sps:$4 sm:$0xff]  }
  0x45   :  { %184 = vmatprep.subr.bf16.mxu0 %v3878_v0  ;;  %586 = vmatpush1.bf16.msra.mxu1 %v3282_v20  ;;  %v3345_v3 = vld [vmem:[#allocation5 + $0x34] ss:$8 sps:$4 sm:$0xff]   ;;  %v3310_v4 = vld [vmem:[%s5048_s4 + $0xa0] ss:$24 sps:$4 sm:$0xff]   ;;  %v3315_v5 = vld [vmem:[%s5048_s4 + $0xd4] ss:$24 sps:$4 sm:$0xff]  }
  0x46   :  { %587 = vmatprep.subr.bf16.mxu1 %v3286_v21  ;;  %v3343_v6 = vld [vmem:[#allocation5 + $0x30] ss:$8 sps:$4 sm:$0xff]   ;;  %v3351_v7 = vld [vmem:[#allocation5 + $0x44] ss:$8 sps:$4 sm:$0xff]   ;;  %v3313_v8 = vld [vmem:[%s5048_s4 + $0xd0] ss:$24 sps:$4 sm:$0xff]  }
  0x47   :  { %v3318_v9 = vld [vmem:[%s5048_s4 + $0x104] ss:$24 sps:$4 sm:$0xff]   ;;  %v3349_v10 = vld [vmem:[#allocation5 + $0x40] ss:$8 sps:$4 sm:$0xff]   ;;  %v3316_v12 = vld [vmem:[%s5048_s4 + $0x100] ss:$24 sps:$4 sm:$0xff]  }
  0x48   :  { %185 = vmatpush1.bf16.msra.mxu0 %v3249_v13  ;;  %v3357_v11 = vld [vmem:[#allocation5 + $0x54] ss:$8 sps:$4 sm:$0xff]   ;;  %v3321_v13 = vld [vmem:[%s5048_s4 + $0x134] ss:$24 sps:$4 sm:$0xff]   ;;  %v3355_v14 = vld [vmem:[#allocation5 + $0x50] ss:$8 sps:$4 sm:$0xff]  }
  0x49   :  { %186 = vmatprep.subr.bf16.mxu0 %v3878_v0  ;;  %588 = vmatpush1.bf16.msra.mxu1 %v3288_v24  ;;  %v3363_v15 = vld [vmem:[#allocation5 + $0x64] ss:$8 sps:$4 sm:$0xff]   ;;  %v3324_v17 = vld [vmem:[%s5048_s4 + $0x164] ss:$24 sps:$4 sm:$0xff]   ;;  %v3361_v18 = vld [vmem:[#allocation5 + $0x60] ss:$8 sps:$4 sm:$0xff]  }
  0x4a   :  { %589 = vmatprep.subr.bf16.mxu1 %v3292_v26  ;;  %v3322_v20 = vld [vmem:[%s5048_s4 + $0x160] ss:$24 sps:$4 sm:$0xff]   ;;  %v3330_v21 = vld [vmem:[%s5052_s8 + $0x4] ss:$16 sps:$4 sm:$0xff]   ;;  %v3373_v26 = vld [vmem:[#allocation5 + $0x80] ss:$8 sps:$4 sm:$0xff]  }
  0x4b   :  { %v3375_v23 = vld [vmem:[#allocation5 + $0x84] ss:$8 sps:$4 sm:$0xff]   ;;  %v3328_v24 = vld [vmem:[%s5052_s8] ss:$16 sps:$4 sm:$0xff]   ;;  %s3798_s16 = scalar_lea.vmem %s2849_s24, 256 }
  0x4c   :  { %187 = vmatpush1.bf16.msra.mxu0 %v3250_v16  ;;  %v3319_v16 = vld [vmem:[%s5048_s4 + $0x130] ss:$24 sps:$4 sm:$0xff]   ;;  %p3799_p2 = scmp.ne.s32.totalorder %s2849_s24, %s3798_s16  ;;  %p3804_p4 = scmp.lt.s32.totalorder %s3798_s16, %s3798_s16 }
  0x4d   :  { %188 = vmatprep.subr.bf16.mxu0 %v3878_v0  ;;  %590 = vmatpush1.bf16.msra.mxu1 %v3294_v41  ;;  %v3360_v41 = vld [vmem:[%s5052_s8 + $0xa4] ss:$16 sps:$4 sm:$0xff]  }
  0x4e   :  { %591 = vmatprep.subr.bf16.mxu1 %v3298_v44  ;;  %v3358_v44 = vld [vmem:[%s5052_s8 + $0xa0] ss:$16 sps:$4 sm:$0xff]   ;;  %p3805_p5 = por %p3804_p4, %p3803_p3 }
  0x50   :  { %189 = vmatpush1.bf16.msra.mxu0 %v3251_v19  ;;  %v3369_v19 = vld [vmem:[#allocation5 + $0x74] ss:$8 sps:$4 sm:$0xff]   ;;  %p3806_p6 = pnand %p3805_p5, %p3799_p2 }
  0x51   :  { %190 = vmatprep.subr.bf16.mxu0 %v3878_v0  ;;  %592 = vmatpush1.bf16.msra.mxu1 %v3300_v45  ;;  %v3366_v45 = vld [vmem:[%s5052_s8 + $0xc4] ss:$16 sps:$4 sm:$0xff]  }
  0x52   :  { %875 = vmatprep.subr.bf16.mxu1 %v3327_v47  ;;  %v3364_v47 = vld [vmem:[%s5052_s8 + $0xc0] ss:$16 sps:$4 sm:$0xff]  }
  0x54   :  { %191 = vmatpush1.bf16.msra.mxu0 %v3252_v22  ;;  %v3367_v22 = vld [vmem:[#allocation5 + $0x70] ss:$8 sps:$4 sm:$0xff]  }
  0x55   :  { %536 = vmatprep.subr.bf16.mxu0 %v3255_v25  ;;  %v3336_v25 = vld [vmem:[%s5052_s8 + $0x24] ss:$16 sps:$4 sm:$0xff]  }
  0x57   :  { %207 = vmatmul.mubr.bf16.vlgmr.msra.gmra.mrb[0].mxu0 %v89_v28  ;;  %v3334_v28 = vld [vmem:[%s5052_s8 + $0x20] ss:$16 sps:$4 sm:$0xff]  }
  0x58   :  { %537 = vmatpush1.bf16.msra.mxu0 %v3253_v27  ;;  %568 = vmatprep.mubr.bf16.mxu0 %v3878_v0  ;;  %v3381_v27 = vld [vmem:[#allocation5 + $0x94] ss:$8 sps:$4 sm:$0xff]  }
  0x59   :  { %538 = vmatprep.subr.bf16.mxu0 %v3261_v29  ;;  %v3342_v29 = vld [vmem:[%s5052_s8 + $0x44] ss:$16 sps:$4 sm:$0xff]  }
  0x5c   :  { %539 = vmatpush1.bf16.msra.mxu0 %v3259_v30  ;;  %v3379_v30 = vld [vmem:[#allocation5 + $0x90] ss:$8 sps:$4 sm:$0xff]  }
  0x5d   :  { %540 = vmatprep.subr.bf16.mxu0 %v3267_v31  ;;  %v3387_v31 = vld [vmem:[#allocation5 + $0xa4] ss:$8 sps:$4 sm:$0xff]  }
  0x60   :  { %541 = vmatpush1.bf16.msra.mxu0 %v3265_v32  ;;  %v3340_v32 = vld [vmem:[%s5052_s8 + $0x40] ss:$16 sps:$4 sm:$0xff]  }
  0x61   :  { %542 = vmatprep.subr.bf16.mxu0 %v3273_v33  ;;  %v3348_v33 = vld [vmem:[%s5052_s8 + $0x64] ss:$16 sps:$4 sm:$0xff]  }
  0x64   :  { %543 = vmatpush1.bf16.msra.mxu0 %v3271_v34  ;;  %v3385_v34 = vld [vmem:[#allocation5 + $0xa0] ss:$8 sps:$4 sm:$0xff]  }
  0x65   :  { %544 = vmatprep.subr.bf16.mxu0 %v3279_v35  ;;  %v3393_v35 = vld [vmem:[#allocation5 + $0xb4] ss:$8 sps:$4 sm:$0xff]  }
  0x68   :  { %545 = vmatpush1.bf16.msra.mxu0 %v3277_v36  ;;  %v3346_v36 = vld [vmem:[%s5052_s8 + $0x60] ss:$16 sps:$4 sm:$0xff]  }
  0x69   :  { %546 = vmatprep.subr.bf16.mxu0 %v3285_v37  ;;  %v3354_v37 = vld [vmem:[%s5052_s8 + $0x84] ss:$16 sps:$4 sm:$0xff]  }
  0x6c   :  { %547 = vmatpush1.bf16.msra.mxu0 %v3283_v38  ;;  %v3391_v38 = vld [vmem:[#allocation5 + $0xb0] ss:$8 sps:$4 sm:$0xff]  }
  0x6d   :  { %548 = vmatprep.subr.bf16.mxu0 %v3291_v39  ;;  %v3399_v39 = vld [vmem:[#allocation5 + $0xc4] ss:$8 sps:$4 sm:$0xff]  }
  0x70   :  { %549 = vmatpush1.bf16.msra.mxu0 %v3289_v40  ;;  %v3352_v40 = vld [vmem:[%s5052_s8 + $0x80] ss:$16 sps:$4 sm:$0xff]  }
  0x71   :  { %550 = vmatprep.subr.bf16.mxu0 %v3297_v42  ;;  %v3397_v42 = vld [vmem:[#allocation5 + $0xc0] ss:$8 sps:$4 sm:$0xff]  }
  0x74   :  { %551 = vmatpush1.bf16.msra.mxu0 %v3295_v43  ;;  %v3405_v43 = vld [vmem:[#allocation5 + $0xd4] ss:$8 sps:$4 sm:$0xff]  }
  0x75   :  { %618 = vmatprep.subr.bf16.mxu0 %v3303_v46  ;;  %v3403_v46 = vld [vmem:[#allocation5 + $0xd0] ss:$8 sps:$4 sm:$0xff]  }
 0x12a   :  { %v208_v49 = vpop.f32.mrb[0].mxu0 }
 0x12b   :  { %v209_v50 = vadd.f32 %v2875_v48, %v208_v49  ;;  %v210_v51 = vpop.f32.mrb[1].mxu0  ;;  %v3372_v48 = vld [vmem:[%s5052_s8 + $0xe4] ss:$16 sps:$4 sm:$0xff]   ;;  %v3370_v49 = vld [vmem:[%s5052_s8 + $0xe0] ss:$16 sps:$4 sm:$0xff]  }
 0x12c   :  { %v211_v52 = vpop.f32.mrb[2].mxu0  ;;  %v3376_v51 = vld [vmem:[%s5052_s8 + $0x100] ss:$16 sps:$4 sm:$0xff]  }
 0x12d   :  { %v214_v53 = vmax.f32 %v209_v50, 0.0  ;;  %v212_v54 = vpop.f32.mrb[3].mxu0  ;;  %v3378_v50 = vld [vmem:[%s5052_s8 + $0x104] ss:$16 sps:$4 sm:$0xff]  }
 0x12e   :  { %v3384_v52 = vld [vmem:[%s5052_s8 + $0x124] ss:$16 sps:$4 sm:$0xff]  }
 0x12f   :  { %v4125_v56 = vpack.c.bf16 %v214_v53, %v214_v53  ;;  %v3382_v53 = vld [vmem:[%s5052_s8 + $0x120] ss:$16 sps:$4 sm:$0xff]   ;;  %v3390_v54 = vld [vmem:[%s5052_s8 + $0x144] ss:$16 sps:$4 sm:$0xff]  }
 0x131   :  { %569 = vmatmul.mubr.bf16.vlgmr.msra.gmra.mrb[4].mxu0 %v4125_v56  ;;  %610 = vmatmul.mubr.bf16.vlgmr.msra.gmra.mrb[0].mxu1 %v4125_v56 }
 0x132   :  { %619 = vmatpush1.bf16.msra.mxu0 %v3301_v55  ;;  %650 = vmatprep.mubr.bf16.mxu0 %v3878_v0  ;;  %v3337_v0 = vld [vmem:[#allocation5 + $0x20] ss:$8 sps:$4 sm:$0xff]  }
 0x133   :  { %620 = vmatprep.subr.bf16.mxu0 %v3306_v57  ;;  %876 = vmatpush1.bf16.msra.mxu1 %v3325_v58  ;;  %v3388_v55 = vld [vmem:[%s5052_s8 + $0x140] ss:$16 sps:$4 sm:$0xff]   ;;  %v3402_v58 = vld [vmem:[%s5052_s8 + $0x184] ss:$16 sps:$4 sm:$0xff]  }
 0x134   :  { %877 = vmatprep.subr.bf16.mxu1 %v3333_v59  ;;  %v3394_v57 = vld [vmem:[%s5052_s8 + $0x160] ss:$16 sps:$4 sm:$0xff]  }
 0x135   :  { %v3400_v59 = vld [vmem:[%s5052_s8 + $0x180] ss:$16 sps:$4 sm:$0xff]  }
 0x136   :  { %621 = vmatpush1.bf16.msra.mxu0 %v3304_v60  ;;  %v3408_v60 = vld [vmem:[%s5052_s8 + $0x1a4] ss:$16 sps:$4 sm:$0xff]  }
 0x137   :  { %622 = vmatprep.subr.bf16.mxu0 %v3309_v61  ;;  %878 = vmatpush1.bf16.msra.mxu1 %v3331_v62  ;;  %v3406_v61 = vld [vmem:[%s5052_s8 + $0x1a0] ss:$16 sps:$4 sm:$0xff]   ;;  %v3411_v62 = vld [vmem:[#allocation5 + $0xe4] ss:$8 sps:$4 sm:$0xff]  }
 0x138   :  { %879 = vmatprep.subr.bf16.mxu1 %v3339_v63  ;;  %v3414_v63 = vld [vmem:[%s5052_s8 + $0x1c4] ss:$16 sps:$4 sm:$0xff]  }
 0x13a   :  { %623 = vmatpush1.bf16.msra.mxu0 %v3307_v1  ;;  %v3409_v1 = vld [vmem:[#allocation5 + $0xe0] ss:$8 sps:$4 sm:$0xff]  }
 0x13b   :  { %624 = vmatprep.subr.bf16.mxu0 %v3312_v2  ;;  %880 = vmatpush1.bf16.msra.mxu1 %v3337_v0  ;;  %v3412_v2 = vld [vmem:[%s5052_s8 + $0x1c0] ss:$16 sps:$4 sm:$0xff]   ;;  %v3417_v0 = vld [vmem:[#allocation5 + $0xf4] ss:$8 sps:$4 sm:$0xff]  }
 0x13c   :  { %881 = vmatprep.subr.bf16.mxu1 %v3345_v3  ;;  %v3420_v3 = vld [vmem:[%s5052_s8 + $0x1e4] ss:$16 sps:$4 sm:$0xff]  }
 0x13e   :  { %625 = vmatpush1.bf16.msra.mxu0 %v3310_v4  ;;  %v3415_v4 = vld [vmem:[#allocation5 + $0xf0] ss:$8 sps:$4 sm:$0xff]  }
 0x13f   :  { %626 = vmatprep.subr.bf16.mxu0 %v3315_v5  ;;  %882 = vmatpush1.bf16.msra.mxu1 %v3343_v6  ;;  %v3418_v5 = vld [vmem:[%s5052_s8 + $0x1e0] ss:$16 sps:$4 sm:$0xff]   ;;  %v3423_v6 = vld [vmem:[%s5052_s8 + $0x204] ss:$16 sps:$4 sm:$0xff]  }
 0x140   :  { %883 = vmatprep.subr.bf16.mxu1 %v3351_v7  ;;  %v3426_v7 = vld [vmem:[%s5052_s8 + $0xc] ss:$16 sps:$4 sm:$0xff]  }
 0x142   :  { %627 = vmatpush1.bf16.msra.mxu0 %v3313_v8  ;;  %v266_v8 = vlaneseq }
 0x143   :  { %628 = vmatprep.subr.bf16.mxu0 %v3318_v9  ;;  %884 = vmatpush1.bf16.msra.mxu1 %v3349_v10 }
 0x144   :  { %885 = vmatprep.subr.bf16.mxu1 %v3357_v11  ;;  %v4275_v9 = vshrl.u32 %v266_v8, 7 }
 0x146   :  { %629 = vmatpush1.bf16.msra.mxu0 %v3316_v12  ;;  %v4278_v10 = vsub.s32 0, %v4275_v9  ;;  %v276_v11 = vsub.s32 2, %v4275_v9  ;;  %v4284_v12 = vld [vmem:[%s5049_s5] sm:$0x3f] }
 0x147   :  { %630 = vmatprep.subr.bf16.mxu0 %v3321_v13  ;;  %886 = vmatpush1.bf16.msra.mxu1 %v3355_v14  ;;  %v4287_v13 = vsub.s32 1, %v4275_v9  ;;  %v280_v14 = vsub.s32 3, %v4275_v9 }
 0x148   :  { %887 = vmatprep.subr.bf16.mxu1 %v3363_v15  ;;  %v269_v15 = vrot.slane %v4284_v12, %v4278_v10 }
 0x14a   :  { %631 = vmatpush1.bf16.msra.mxu0 %v3319_v16  ;;  %v277_v16 = vrot.slane %v4284_v12, %v276_v11 }
 0x14b   :  { %632 = vmatprep.subr.bf16.mxu0 %v3324_v17  ;;  %888 = vmatpush1.bf16.msra.mxu1 %v3361_v18  ;;  %v273_v17 = vrot.slane %v4284_v12, %v4287_v13  ;;  %v281_v18 = vrot.slane %v4284_v12, %v280_v14 }
 0x14c   :  { %889 = vmatprep.subr.bf16.mxu1 %v3369_v19 }
 0x14e   :  { %633 = vmatpush1.bf16.msra.mxu0 %v3322_v20 }
 0x14f   :  { %1710 = vmatprep.subr.bf16.mxu0 %v3330_v21  ;;  %890 = vmatpush1.bf16.msra.mxu1 %v3367_v22 }
 0x150   :  { %891 = vmatprep.subr.bf16.mxu1 %v3375_v23 }
 0x151   :  { %651 = vmatmul.mubr.bf16.vlgmr.msra.gmra.mrb[8].mxu0 %v4125_v56  ;;  %v3396_v56 = vld [vmem:[%s5052_s8 + $0x164] ss:$16 sps:$4 sm:$0xff]  }
 0x152   :  { %1711 = vmatpush1.bf16.msra.mxu0 %v3328_v24 }
 0x153   :  { %1712 = vmatprep.subr.bf16.mxu0 %v3336_v25  ;;  %892 = vmatpush1.bf16.msra.mxu1 %v3373_v26 }
 0x154   :  { %893 = vmatprep.subr.bf16.mxu1 %v3381_v27 }
 0x156   :  { %1713 = vmatpush1.bf16.msra.mxu0 %v3334_v28 }
 0x157   :  { %1714 = vmatprep.subr.bf16.mxu0 %v3342_v29  ;;  %894 = vmatpush1.bf16.msra.mxu1 %v3379_v30 }
 0x158   :  { %895 = vmatprep.subr.bf16.mxu1 %v3387_v31 }
 0x15a   :  { %1715 = vmatpush1.bf16.msra.mxu0 %v3340_v32 }
 0x15b   :  { %1716 = vmatprep.subr.bf16.mxu0 %v3348_v33  ;;  %896 = vmatpush1.bf16.msra.mxu1 %v3385_v34 }
 0x15c   :  { %897 = vmatprep.subr.bf16.mxu1 %v3393_v35 }
 0x15e   :  { %1717 = vmatpush1.bf16.msra.mxu0 %v3346_v36 }
 0x15f   :  { %1718 = vmatprep.subr.bf16.mxu0 %v3354_v37  ;;  %898 = vmatpush1.bf16.msra.mxu1 %v3391_v38  ;;  %v3421_v37 = vld [vmem:[%s5052_s8 + $0x200] ss:$16 sps:$4 sm:$0xff]   ;;  %v3424_v38 = vld [vmem:[%s5052_s8 + $0x8] ss:$16 sps:$4 sm:$0xff]  }
 0x160   :  { %899 = vmatprep.subr.bf16.mxu1 %v3399_v39 }
 0x162   :  { %1719 = vmatpush1.bf16.msra.mxu0 %v3352_v40 }
 0x163   :  { %1720 = vmatprep.subr.bf16.mxu0 %v3360_v41  ;;  %900 = vmatpush1.bf16.msra.mxu1 %v3397_v42  ;;  %v3429_v41 = vld [vmem:[%s5052_s8 + $0x224] ss:$16 sps:$4 sm:$0xff]   ;;  %v3432_v42 = vld [vmem:[%s5052_s8 + $0x2c] ss:$16 sps:$4 sm:$0xff]  }
 0x164   :  { %901 = vmatprep.subr.bf16.mxu1 %v3405_v43  ;;  %v3427_v43 = vld [vmem:[%s5052_s8 + $0x220] ss:$16 sps:$4 sm:$0xff]  }
 0x166   :  { %1721 = vmatpush1.bf16.msra.mxu0 %v3358_v44  ;;  %v3430_v44 = vld [vmem:[%s5052_s8 + $0x28] ss:$16 sps:$4 sm:$0xff]  }
 0x167   :  { %1722 = vmatprep.subr.bf16.mxu0 %v3366_v45  ;;  %902 = vmatpush1.bf16.msra.mxu1 %v3403_v46  ;;  %v3435_v45 = vld [vmem:[%s5052_s8 + $0x244] ss:$16 sps:$4 sm:$0xff]   ;;  %v3438_v46 = vld [vmem:[%s5052_s8 + $0x4c] ss:$16 sps:$4 sm:$0xff]  }
 0x168   :  { %903 = vmatprep.subr.bf16.mxu1 %v3411_v62  ;;  %v3459_v62 = vld [vmem:[%s5052_s8 + $0x2c4] ss:$16 sps:$4 sm:$0xff]  }
 0x16a   :  { %1723 = vmatpush1.bf16.msra.mxu0 %v3364_v47  ;;  %v3433_v47 = vld [vmem:[%s5052_s8 + $0x240] ss:$16 sps:$4 sm:$0xff]  }
 0x16b   :  { %1724 = vmatprep.subr.bf16.mxu0 %v3372_v48  ;;  %904 = vmatpush1.bf16.msra.mxu1 %v3409_v1  ;;  %v3436_v48 = vld [vmem:[%s5052_s8 + $0x48] ss:$16 sps:$4 sm:$0xff]  }
 0x16c   :  { %905 = vmatprep.subr.bf16.mxu1 %v3417_v0  ;;  %v3460_v0 = vld [vmem:[%s5052_s8 + $0xc8] ss:$16 sps:$4 sm:$0xff]  }
 0x16e   :  { %1725 = vmatpush1.bf16.msra.mxu0 %v3370_v49  ;;  %v3441_v49 = vld [vmem:[%s5052_s8 + $0x264] ss:$16 sps:$4 sm:$0xff]  }
 0x16f   :  { %1726 = vmatprep.subr.bf16.mxu0 %v3378_v50  ;;  %906 = vmatpush1.bf16.msra.mxu1 %v3415_v4  ;;  %v3444_v50 = vld [vmem:[%s5052_s8 + $0x6c] ss:$16 sps:$4 sm:$0xff]  }
 0x170   :  { %1792 = vmatprep.subr.bf16.mxu1 %v3426_v7  ;;  %v3468_v4 = vld [vmem:[%s5052_s8 + $0xec] ss:$16 sps:$4 sm:$0xff]  }
 0x172   :  { %1727 = vmatpush1.bf16.msra.mxu0 %v3376_v51  ;;  %v3439_v51 = vld [vmem:[%s5052_s8 + $0x260] ss:$16 sps:$4 sm:$0xff]  }
 0x173   :  { %1728 = vmatprep.subr.bf16.mxu0 %v3384_v52  ;;  %v3442_v52 = vld [vmem:[%s5052_s8 + $0x68] ss:$16 sps:$4 sm:$0xff]  }
 0x176   :  { %1729 = vmatpush1.bf16.msra.mxu0 %v3382_v53  ;;  %v3447_v53 = vld [vmem:[%s5052_s8 + $0x284] ss:$16 sps:$4 sm:$0xff]  }
 0x177   :  { %1730 = vmatprep.subr.bf16.mxu0 %v3390_v54  ;;  %v3450_v54 = vld [vmem:[%s5052_s8 + $0x8c] ss:$16 sps:$4 sm:$0xff]  }
 0x17a   :  { %1731 = vmatpush1.bf16.msra.mxu0 %v3388_v55  ;;  %v3445_v55 = vld [vmem:[%s5052_s8 + $0x280] ss:$16 sps:$4 sm:$0xff]  }
 0x17b   :  { %1732 = vmatprep.subr.bf16.mxu0 %v3396_v56  ;;  %v3448_v56 = vld [vmem:[%s5052_s8 + $0x88] ss:$16 sps:$4 sm:$0xff]  }
 0x17e   :  { %1733 = vmatpush1.bf16.msra.mxu0 %v3394_v57  ;;  %v3453_v57 = vld [vmem:[%s5052_s8 + $0x2a4] ss:$16 sps:$4 sm:$0xff]  }
 0x17f   :  { %1734 = vmatprep.subr.bf16.mxu0 %v3402_v58  ;;  %v3456_v58 = vld [vmem:[%s5052_s8 + $0xac] ss:$16 sps:$4 sm:$0xff]  }
 0x182   :  { %1735 = vmatpush1.bf16.msra.mxu0 %v3400_v59  ;;  %v3451_v59 = vld [vmem:[%s5052_s8 + $0x2a0] ss:$16 sps:$4 sm:$0xff]  }
 0x183   :  { %1736 = vmatprep.subr.bf16.mxu0 %v3408_v60  ;;  %v3454_v60 = vld [vmem:[%s5052_s8 + $0xa8] ss:$16 sps:$4 sm:$0xff]  }
 0x186   :  { %1737 = vmatpush1.bf16.msra.mxu0 %v3406_v61  ;;  %v288_v61 = vsub.s32 5, %v4275_v9 }
 0x187   :  { %1738 = vmatprep.subr.bf16.mxu0 %v3414_v63  ;;  %v3462_v63 = vld [vmem:[%s5052_s8 + $0xcc] ss:$16 sps:$4 sm:$0xff]  }
 0x188   :  { %v289_v1 = vrot.slane %v4284_v12, %v288_v61  ;;  %v3565_v61 = vld [vmem:[%s5054_s10] ss:$8 sps:$4 sm:$0xff]  }
 0x18a   :  { %1739 = vmatpush1.bf16.msra.mxu0 %v3412_v2  ;;  %v3457_v2 = vld [vmem:[%s5052_s8 + $0x2c0] ss:$16 sps:$4 sm:$0xff]  }
 0x18b   :  { %1740 = vmatprep.subr.bf16.mxu0 %v3420_v3  ;;  %v3465_v3 = vld [vmem:[%s5052_s8 + $0x2e4] ss:$16 sps:$4 sm:$0xff]  }
 0x18e   :  { %1741 = vmatpush1.bf16.msra.mxu0 %v3418_v5 }
 0x18f   :  { %1751 = vmatprep.subr.bf16.mxu0 %v3423_v6 }
 0x204   :  { %v570_v19 = vpop.f32.mrb[4].mxu0  ;;  %v611_v20 = vpop.f32.mrb[0].mxu1 }
 0x205   :  { %v571_v21 = vadd.f32 %v570_v19, %v269_v15  ;;  %v612_v22 = vadd.f32 %v611_v20, %v277_v16  ;;  %v572_v23 = vpop.f32.mrb[5].mxu0  ;;  %v613_v24 = vpop.f32.mrb[1].mxu1  ;;  %v3463_v15 = vld [vmem:[%s5052_s8 + $0x2e0] ss:$16 sps:$4 sm:$0xff]   ;;  %v3466_v16 = vld [vmem:[%s5052_s8 + $0xe8] ss:$16 sps:$4 sm:$0xff]  }
 0x206   :  { %v573_v25 = vadd.f32 %v572_v23, %v273_v17  ;;  %v614_v26 = vadd.f32 %v613_v24, %v281_v18  ;;  %v574_v27 = vpop.f32.mrb[6].mxu0  ;;  %v615_v28 = vpop.f32.mrb[2].mxu1  ;;  %v3471_v18 = vld [vmem:[%s5052_s8 + $0x304] ss:$16 sps:$4 sm:$0xff]   ;;  %v3474_v19 = vld [vmem:[%s5052_s8 + $0x10c] ss:$16 sps:$4 sm:$0xff]  }
 0x207   :  { %v659_v29 = vmax.f32 %v571_v21, 0.0  ;;  %v661_v30 = vmax.f32 %v612_v22, 0.0  ;;  %v575_v31 = vpop.f32.mrb[7].mxu0  ;;  %v616_v32 = vpop.f32.mrb[3].mxu1  ;;  %v3469_v22 = vld [vmem:[%s5052_s8 + $0x300] ss:$16 sps:$4 sm:$0xff]  }
 0x208   :  { %v660_v33 = vmax.f32 %v573_v25, 0.0  ;;  %v662_v34 = vmax.f32 %v614_v26, 0.0  ;;  %v3472_v23 = vld [vmem:[%s5052_s8 + $0x108] ss:$16 sps:$4 sm:$0xff]   ;;  %v3477_v24 = vld [vmem:[%s5052_s8 + $0x324] ss:$16 sps:$4 sm:$0xff]  }
 0x209   :  { %v665_v39 = vpack.c.bf16 %v659_v29, %v659_v29  ;;  %v4306_v40 = vpack.c.bf16 %v661_v30, %v661_v30  ;;  %v3480_v25 = vld [vmem:[%s5052_s8 + $0x12c] ss:$16 sps:$4 sm:$0xff]   ;;  %v3475_v26 = vld [vmem:[%s5052_s8 + $0x320] ss:$16 sps:$4 sm:$0xff]   ;;  %v3478_v27 = vld [vmem:[%s5052_s8 + $0x128] ss:$16 sps:$4 sm:$0xff]  }
 0x20a   :  { %v666_v35 = vpack.c.bf16 %v660_v33, %v660_v33  ;;  %v668_v36 = vpack.c.bf16 %v662_v34, %v662_v34  ;;  %v3483_v28 = vld [vmem:[%s5052_s8 + $0x344] ss:$16 sps:$4 sm:$0xff]   ;;  %v3486_v29 = vld [vmem:[%s5052_s8 + $0x14c] ss:$16 sps:$4 sm:$0xff]   ;;  %v3481_v30 = vld [vmem:[%s5052_s8 + $0x340] ss:$16 sps:$4 sm:$0xff]  }
 0x20b   :  { %v3484_v31 = vld [vmem:[%s5052_s8 + $0x148] ss:$16 sps:$4 sm:$0xff]   ;;  %v3489_v32 = vld [vmem:[%s5052_s8 + $0x364] ss:$16 sps:$4 sm:$0xff]   ;;  %v3492_v33 = vld [vmem:[%s5052_s8 + $0x16c] ss:$16 sps:$4 sm:$0xff]  }
 0x20c   :  { %907 = vmatprep.mubr.bf16.mxu1 %v666_v35  ;;  %1742 = vmatprep.mubr.bf16.mxu0 %v668_v36  ;;  %v3487_v34 = vld [vmem:[%s5052_s8 + $0x360] ss:$16 sps:$4 sm:$0xff]   ;;  %v3490_v35 = vld [vmem:[%s5052_s8 + $0x168] ss:$16 sps:$4 sm:$0xff]  }
 0x20d   :  { %908 = vmatmul.mubr.bf16.vlgmr.msra.gmra.mrb[4].mxu1 %v665_v39  ;;  %1743 = vmatmul.mubr.bf16.vlgmr.msra.gmra.mrb[12].mxu0 %v4306_v40  ;;  %v3496_v39 = vld [vmem:[%s5052_s8 + $0x188] ss:$16 sps:$4 sm:$0xff]  }
 0x20e   :  { %1752 = vmatpush1.bf16.msra.mxu0 %v3421_v37  ;;  %1793 = vmatpush1.bf16.msra.mxu1 %v3424_v38  ;;  %v3498_v37 = vld [vmem:[%s5052_s8 + $0x18c] ss:$16 sps:$4 sm:$0xff]   ;;  %v3493_v38 = vld [vmem:[%s5052_s8 + $0x380] ss:$16 sps:$4 sm:$0xff]  }
 0x20f   :  { %1824 = vmatprep.mubr.bf16.mxu1 %v668_v36  ;;  %1753 = vmatprep.subr.bf16.mxu0 %v3429_v41  ;;  %v3495_v36 = vld [vmem:[%s5052_s8 + $0x384] ss:$16 sps:$4 sm:$0xff]   ;;  %v284_v41 = vsub.s32 4, %v4275_v9  ;;  %v3706_v9 = vld [vmem:[%s5056_s12 + $0x1f0] ss:$8 sps:$4 sm:$0xff]  }
 0x210   :  { %1794 = vmatprep.subr.bf16.mxu1 %v3432_v42  ;;  %v3501_v42 = vld [vmem:[%s5052_s8 + $0x3a4] ss:$16 sps:$4 sm:$0xff]  }
 0x212   :  { %1754 = vmatpush1.bf16.msra.mxu0 %v3427_v43  ;;  %1795 = vmatpush1.bf16.msra.mxu1 %v3430_v44  ;;  %v3504_v43 = vld [vmem:[%s5052_s8 + $0x1ac] ss:$16 sps:$4 sm:$0xff]   ;;  %v3499_v44 = vld [vmem:[%s5052_s8 + $0x3a0] ss:$16 sps:$4 sm:$0xff]  }
 0x213   :  { %1755 = vmatprep.subr.bf16.mxu0 %v3435_v45  ;;  %1796 = vmatprep.subr.bf16.mxu1 %v3438_v46  ;;  %v3502_v45 = vld [vmem:[%s5052_s8 + $0x1a8] ss:$16 sps:$4 sm:$0xff]   ;;  %v285_v46 = vrot.slane %v4284_v12, %v284_v41 }
 0x214   :  { %v3508_v12 = vld [vmem:[%s5052_s8 + $0x1c8] ss:$16 sps:$4 sm:$0xff]  }
 0x215   :  { %v3547_v41 = vld [vmem:[%s5052_s8 + $0x348] ss:$16 sps:$4 sm:$0xff]  }
 0x216   :  { %1756 = vmatpush1.bf16.msra.mxu0 %v3433_v47  ;;  %1797 = vmatpush1.bf16.msra.mxu1 %v3436_v48  ;;  %v3507_v47 = vld [vmem:[%s5052_s8 + $0x3c4] ss:$16 sps:$4 sm:$0xff]   ;;  %v3510_v48 = vld [vmem:[%s5052_s8 + $0x1cc] ss:$16 sps:$4 sm:$0xff]  }
 0x217   :  { %1757 = vmatprep.subr.bf16.mxu0 %v3441_v49  ;;  %1798 = vmatprep.subr.bf16.mxu1 %v3444_v50  ;;  %v3505_v49 = vld [vmem:[%s5052_s8 + $0x3c0] ss:$16 sps:$4 sm:$0xff]  }
 0x21a   :  { %1758 = vmatpush1.bf16.msra.mxu0 %v3439_v51  ;;  %1799 = vmatpush1.bf16.msra.mxu1 %v3442_v52  ;;  %v3513_v51 = vld [vmem:[%s5052_s8 + $0x3e4] ss:$16 sps:$4 sm:$0xff]   ;;  %v3516_v52 = vld [vmem:[%s5052_s8 + $0x1ec] ss:$16 sps:$4 sm:$0xff]  }
 0x21b   :  { %1759 = vmatprep.subr.bf16.mxu0 %v3447_v53  ;;  %1800 = vmatprep.subr.bf16.mxu1 %v3450_v54  ;;  %v3511_v53 = vld [vmem:[%s5052_s8 + $0x3e0] ss:$16 sps:$4 sm:$0xff]   ;;  %v3514_v54 = vld [vmem:[%s5052_s8 + $0x1e8] ss:$16 sps:$4 sm:$0xff]  }
 0x21e   :  { %1760 = vmatpush1.bf16.msra.mxu0 %v3445_v55  ;;  %1801 = vmatpush1.bf16.msra.mxu1 %v3448_v56  ;;  %v3519_v56 = vld [vmem:[%s5052_s8 + $0x20c] ss:$16 sps:$4 sm:$0xff]  }
 0x21f   :  { %1761 = vmatprep.subr.bf16.mxu0 %v3453_v57  ;;  %1802 = vmatprep.subr.bf16.mxu1 %v3456_v58  ;;  %v3567_v57 = vld [vmem:[%s5054_s10 + $0x4] ss:$8 sps:$4 sm:$0xff]   ;;  %v3517_v58 = vld [vmem:[%s5052_s8 + $0x208] ss:$16 sps:$4 sm:$0xff]  }
 0x222   :  { %1762 = vmatpush1.bf16.msra.mxu0 %v3451_v59  ;;  %1803 = vmatpush1.bf16.msra.mxu1 %v3454_v60  ;;  %v3522_v60 = vld [vmem:[%s5052_s8 + $0x22c] ss:$16 sps:$4 sm:$0xff]  }
 0x223   :  { %1763 = vmatprep.subr.bf16.mxu0 %v3459_v62  ;;  %1804 = vmatprep.subr.bf16.mxu1 %v3462_v63  ;;  %v3570_v62 = vld [vmem:[%s5054_s10 + $0x14] ss:$8 sps:$4 sm:$0xff]   ;;  %v3520_v63 = vld [vmem:[%s5052_s8 + $0x228] ss:$16 sps:$4 sm:$0xff]  }
 0x224   :  { %v4389_v5 = vpop.f32.mrb[8].mxu0 }
 0x225   :  { %v654_v6 = vpop.f32.mrb[9].mxu0  ;;  %v653_v50 = vadd.f32 %v4389_v5, %v285_v46  ;;  %v3576_v5 = vld [vmem:[%s5054_s10 + $0x34] ss:$8 sps:$4 sm:$0xff]  }
 0x226   :  { %v655_v7 = vadd.f32 %v654_v6, %v289_v1  ;;  %v656_v8 = vpop.f32.mrb[10].mxu0  ;;  %1764 = vmatpush1.bf16.msra.mxu0 %v3457_v2  ;;  %1805 = vmatpush1.bf16.msra.mxu1 %v3460_v0  ;;  %v3525_v1 = vld [vmem:[%s5052_s8 + $0x24c] ss:$16 sps:$4 sm:$0xff]   ;;  %v3568_v2 = vld [vmem:[%s5054_s10 + $0x10] ss:$8 sps:$4 sm:$0xff]  }
 0x227   :  { %v657_v17 = vpop.f32.mrb[11].mxu0  ;;  %1765 = vmatprep.subr.bf16.mxu0 %v3465_v3  ;;  %1806 = vmatprep.subr.bf16.mxu1 %v3468_v4  ;;  %v663_v55 = vmax.f32 %v653_v50, 0.0  ;;  %v3523_v0 = vld [vmem:[%s5052_s8 + $0x248] ss:$16 sps:$4 sm:$0xff]   ;;  %v3528_v3 = vld [vmem:[%s5052_s8 + $0x26c] ss:$16 sps:$4 sm:$0xff]  }
 0x228   :  { %v664_v20 = vmax.f32 %v655_v7, 0.0  ;;  %v3571_v4 = vld [vmem:[%s5054_s10 + $0x20] ss:$8 sps:$4 sm:$0xff]   ;;  %v3531_v7 = vld [vmem:[%s5052_s8 + $0x28c] ss:$16 sps:$4 sm:$0xff]  }
 0x229   :  { %v4508_v59 = vpack.c.bf16 %v663_v55, %v663_v55  ;;  %v3526_v6 = vld [vmem:[%s5052_s8 + $0x268] ss:$16 sps:$4 sm:$0xff]   ;;  %v3534_v17 = vld [vmem:[%s5052_s8 + $0x2ac] ss:$16 sps:$4 sm:$0xff]  }
 0x22a   :  { %v4403_v21 = vpack.c.bf16 %v664_v20, %v664_v20  ;;  %1766 = vmatpush1.bf16.msra.mxu0 %v3463_v15  ;;  %1807 = vmatpush1.bf16.msra.mxu1 %v3466_v16  ;;  %v3574_v8 = vld [vmem:[%s5054_s10 + $0x30] ss:$8 sps:$4 sm:$0xff]   ;;  %v3579_v15 = vld [vmem:[%s5054_s10 + $0x44] ss:$8 sps:$4 sm:$0xff]   ;;  %v3601_v50 = vld [vmem:[%s5054_s10 + $0xc0] ss:$8 sps:$4 sm:$0xff]  }
 0x22b   :  { %1767 = vmatprep.subr.bf16.mxu0 %v3471_v18  ;;  %1808 = vmatprep.subr.bf16.mxu1 %v3474_v19  ;;  %v3529_v16 = vld [vmem:[%s5052_s8 + $0x288] ss:$16 sps:$4 sm:$0xff]   ;;  %v3582_v19 = vld [vmem:[%s5054_s10 + $0x54] ss:$8 sps:$4 sm:$0xff]   ;;  %v3609_v55 = vld [vmem:[%s5054_s10 + $0xe4] ss:$8 sps:$4 sm:$0xff]  }
 0x22c   :  { %1783 = vmatprep.mubr.bf16.mxu0 %v4403_v21  ;;  %v3577_v18 = vld [vmem:[%s5054_s10 + $0x40] ss:$8 sps:$4 sm:$0xff]   ;;  %v3555_v46 = vld [vmem:[%s5052_s8 + $0x38c] ss:$16 sps:$4 sm:$0xff]  }
 0x22d   :  { %v3532_v20 = vld [vmem:[%s5052_s8 + $0x2a8] ss:$16 sps:$4 sm:$0xff]  }
 0x22e   :  { %1768 = vmatpush1.bf16.msra.mxu0 %v3469_v22  ;;  %1809 = vmatpush1.bf16.msra.mxu1 %v3472_v23  ;;  %v3580_v22 = vld [vmem:[%s5054_s10 + $0x50] ss:$8 sps:$4 sm:$0xff]   ;;  %v3585_v23 = vld [vmem:[%s5054_s10 + $0x64] ss:$8 sps:$4 sm:$0xff]  }
 0x22f   :  { %1769 = vmatprep.subr.bf16.mxu0 %v3477_v24  ;;  %1810 = vmatprep.subr.bf16.mxu1 %v3480_v25  ;;  %v3535_v24 = vld [vmem:[%s5052_s8 + $0x2c8] ss:$16 sps:$4 sm:$0xff]   ;;  %v3540_v25 = vld [vmem:[%s5052_s8 + $0x2ec] ss:$16 sps:$4 sm:$0xff]  }
 0x232   :  { %1770 = vmatpush1.bf16.msra.mxu0 %v3475_v26  ;;  %1811 = vmatpush1.bf16.msra.mxu1 %v3478_v27  ;;  %v3583_v26 = vld [vmem:[%s5054_s10 + $0x60] ss:$8 sps:$4 sm:$0xff]   ;;  %v3588_v27 = vld [vmem:[%s5054_s10 + $0x74] ss:$8 sps:$4 sm:$0xff]  }
 0x233   :  { %1771 = vmatprep.subr.bf16.mxu0 %v3483_v28  ;;  %1812 = vmatprep.subr.bf16.mxu1 %v3486_v29  ;;  %v3538_v28 = vld [vmem:[%s5052_s8 + $0x2e8] ss:$16 sps:$4 sm:$0xff]   ;;  %v3543_v29 = vld [vmem:[%s5052_s8 + $0x30c] ss:$16 sps:$4 sm:$0xff]  }
 0x236   :  { %1772 = vmatpush1.bf16.msra.mxu0 %v3481_v30  ;;  %1813 = vmatpush1.bf16.msra.mxu1 %v3484_v31  ;;  %v3586_v30 = vld [vmem:[%s5054_s10 + $0x70] ss:$8 sps:$4 sm:$0xff]   ;;  %v3591_v31 = vld [vmem:[%s5054_s10 + $0x84] ss:$8 sps:$4 sm:$0xff]  }
 0x237   :  { %1773 = vmatprep.subr.bf16.mxu0 %v3489_v32  ;;  %1814 = vmatprep.subr.bf16.mxu1 %v3492_v33  ;;  %v3541_v32 = vld [vmem:[%s5052_s8 + $0x308] ss:$16 sps:$4 sm:$0xff]   ;;  %v3546_v33 = vld [vmem:[%s5052_s8 + $0x32c] ss:$16 sps:$4 sm:$0xff]  }
 0x23a   :  { %1774 = vmatpush1.bf16.msra.mxu0 %v3487_v34  ;;  %1815 = vmatpush1.bf16.msra.mxu1 %v3490_v35  ;;  %v3589_v34 = vld [vmem:[%s5054_s10 + $0x80] ss:$8 sps:$4 sm:$0xff]   ;;  %v3594_v35 = vld [vmem:[%s5054_s10 + $0x94] ss:$8 sps:$4 sm:$0xff]  }
 0x23b   :  { %1775 = vmatprep.subr.bf16.mxu0 %v3495_v36  ;;  %1816 = vmatprep.subr.bf16.mxu1 %v3498_v37  ;;  %v3544_v36 = vld [vmem:[%s5052_s8 + $0x328] ss:$16 sps:$4 sm:$0xff]   ;;  %v3549_v37 = vld [vmem:[%s5052_s8 + $0x34c] ss:$16 sps:$4 sm:$0xff]  }
 0x23e   :  { %1776 = vmatpush1.bf16.msra.mxu0 %v3493_v38  ;;  %1817 = vmatpush1.bf16.msra.mxu1 %v3496_v39  ;;  %v3592_v38 = vld [vmem:[%s5054_s10 + $0x90] ss:$8 sps:$4 sm:$0xff]   ;;  %v3597_v39 = vld [vmem:[%s5054_s10 + $0xa4] ss:$8 sps:$4 sm:$0xff]  }
 0x23f   :  { %1777 = vmatprep.subr.bf16.mxu0 %v3501_v42  ;;  %1818 = vmatprep.subr.bf16.mxu1 %v3504_v43  ;;  %v3552_v42 = vld [vmem:[%s5052_s8 + $0x36c] ss:$16 sps:$4 sm:$0xff]   ;;  %v3595_v43 = vld [vmem:[%s5054_s10 + $0xa0] ss:$8 sps:$4 sm:$0xff]  }
 0x242   :  { %1778 = vmatpush1.bf16.msra.mxu0 %v3499_v44  ;;  %1819 = vmatpush1.bf16.msra.mxu1 %v3502_v45  ;;  %v3600_v44 = vld [vmem:[%s5054_s10 + $0xb4] ss:$8 sps:$4 sm:$0xff]   ;;  %v3550_v45 = vld [vmem:[%s5052_s8 + $0x368] ss:$16 sps:$4 sm:$0xff]  }
 0x243   :  { %1779 = vmatprep.subr.bf16.mxu0 %v3507_v47  ;;  %1820 = vmatprep.subr.bf16.mxu1 %v3510_v48  ;;  %v3598_v47 = vld [vmem:[%s5054_s10 + $0xb0] ss:$8 sps:$4 sm:$0xff]   ;;  %v3603_v48 = vld [vmem:[%s5054_s10 + $0xc4] ss:$8 sps:$4 sm:$0xff]  }
 0x246   :  { %1780 = vmatpush1.bf16.msra.mxu0 %v3505_v49  ;;  %1821 = vmatpush1.bf16.msra.mxu1 %v3508_v12  ;;  %v3553_v49 = vld [vmem:[%s5052_s8 + $0x388] ss:$16 sps:$4 sm:$0xff]   ;;  %v3558_v12 = vld [vmem:[%s5052_s8 + $0x3ac] ss:$16 sps:$4 sm:$0xff]  }
 0x247   :  { %1781 = vmatprep.subr.bf16.mxu0 %v3513_v51  ;;  %1822 = vmatprep.subr.bf16.mxu1 %v3516_v52  ;;  %v3606_v51 = vld [vmem:[%s5054_s10 + $0xd4] ss:$8 sps:$4 sm:$0xff]   ;;  %v3556_v52 = vld [vmem:[%s5052_s8 + $0x3a8] ss:$16 sps:$4 sm:$0xff]  }
 0x24a   :  { %1782 = vmatpush1.bf16.msra.mxu0 %v3511_v53  ;;  %1823 = vmatpush1.bf16.msra.mxu1 %v3514_v54  ;;  %v3561_v53 = vld [vmem:[%s5052_s8 + $0x3cc] ss:$16 sps:$4 sm:$0xff]   ;;  %v3604_v54 = vld [vmem:[%s5054_s10 + $0xd0] ss:$8 sps:$4 sm:$0xff]  }
 0x24b   :  { %1833 = vmatprep.subr.bf16.mxu1 %v3519_v56  ;;  %2086 = vmatprep.subr.bf16.mxu0 %v3567_v57  ;;  %v3559_v56 = vld [vmem:[%s5052_s8 + $0x3c8] ss:$16 sps:$4 sm:$0xff]   ;;  %v3564_v57 = vld [vmem:[%s5052_s8 + $0x3ec] ss:$16 sps:$4 sm:$0xff]  }
 0x24d   :  { %1784 = vmatmul.mubr.bf16.vlgmr.msra.gmra.mrb[12].mxu0 %v4508_v59  ;;  %1825 = vmatmul.mubr.bf16.vlgmr.msra.gmra.mrb[8].mxu1 %v4306_v40  ;;  %v3573_v40 = vld [vmem:[%s5054_s10 + $0x24] ss:$8 sps:$4 sm:$0xff]  }
 0x24e   :  { %1834 = vmatpush1.bf16.msra.mxu1 %v3517_v58  ;;  %1865 = vmatprep.mubr.bf16.mxu1 %v4403_v21  ;;  %v3537_v21 = vld [vmem:[%s5052_s8 + $0x2cc] ss:$16 sps:$4 sm:$0xff]   ;;  %v3607_v58 = vld [vmem:[%s5054_s10 + $0xe0] ss:$8 sps:$4 sm:$0xff]  }
 0x24f   :  { %1835 = vmatprep.subr.bf16.mxu1 %v3522_v60  ;;  %2087 = vmatpush1.bf16.msra.mxu0 %v3565_v61  ;;  %v3612_v60 = vld [vmem:[%s5054_s10 + $0xf4] ss:$8 sps:$4 sm:$0xff]   ;;  %v3562_v61 = vld [vmem:[%s5052_s8 + $0x3e8] ss:$16 sps:$4 sm:$0xff]  }
 0x250   :  { %2088 = vmatprep.subr.bf16.mxu0 %v3570_v62  ;;  %v3610_v62 = vld [vmem:[%s5054_s10 + $0xf0] ss:$8 sps:$4 sm:$0xff]  }
 0x252   :  { %1836 = vmatpush1.bf16.msra.mxu1 %v3520_v63  ;;  %v3615_v63 = vld [vmem:[%s5056_s12 + $0x4] ss:$8 sps:$4 sm:$0xff]  }
 0x253   :  { %1837 = vmatprep.subr.bf16.mxu1 %v3525_v1  ;;  %2089 = vmatpush1.bf16.msra.mxu0 %v3568_v2  ;;  %v3613_v1 = vld [vmem:[%s5056_s12] ss:$8 sps:$4 sm:$0xff]   ;;  %v3618_v2 = vld [vmem:[%s5056_s12 + $0x14] ss:$8 sps:$4 sm:$0xff]  }
 0x254   :  { %2090 = vmatprep.subr.bf16.mxu0 %v3573_v40  ;;  %v3616_v40 = vld [vmem:[%s5056_s12 + $0x10] ss:$8 sps:$4 sm:$0xff]  }
 0x256   :  { %1838 = vmatpush1.bf16.msra.mxu1 %v3523_v0  ;;  %v3621_v0 = vld [vmem:[%s5056_s12 + $0x24] ss:$8 sps:$4 sm:$0xff]  }
 0x257   :  { %1839 = vmatprep.subr.bf16.mxu1 %v3528_v3  ;;  %2091 = vmatpush1.bf16.msra.mxu0 %v3571_v4  ;;  %v3619_v3 = vld [vmem:[%s5056_s12 + $0x20] ss:$8 sps:$4 sm:$0xff]   ;;  %v3622_v4 = vld [vmem:[%s5056_s12 + $0x30] ss:$8 sps:$4 sm:$0xff]  }
 0x258   :  { %2092 = vmatprep.subr.bf16.mxu0 %v3576_v5  ;;  %v3627_v5 = vld [vmem:[%s5056_s12 + $0x44] ss:$8 sps:$4 sm:$0xff]  }
 0x25a   :  { %1840 = vmatpush1.bf16.msra.mxu1 %v3526_v6  ;;  %v3625_v6 = vld [vmem:[%s5056_s12 + $0x40] ss:$8 sps:$4 sm:$0xff]  }
 0x25b   :  { %1841 = vmatprep.subr.bf16.mxu1 %v3531_v7  ;;  %2093 = vmatpush1.bf16.msra.mxu0 %v3574_v8  ;;  %v3630_v7 = vld [vmem:[%s5056_s12 + $0x54] ss:$8 sps:$4 sm:$0xff]   ;;  %v3628_v8 = vld [vmem:[%s5056_s12 + $0x50] ss:$8 sps:$4 sm:$0xff]  }
 0x25c   :  { %2094 = vmatprep.subr.bf16.mxu0 %v3579_v15  ;;  %v3633_v15 = vld [vmem:[%s5056_s12 + $0x64] ss:$8 sps:$4 sm:$0xff]  }
 0x25e   :  { %1842 = vmatpush1.bf16.msra.mxu1 %v3529_v16  ;;  %v3631_v16 = vld [vmem:[%s5056_s12 + $0x60] ss:$8 sps:$4 sm:$0xff]  }
 0x25f   :  { %1843 = vmatprep.subr.bf16.mxu1 %v3534_v17  ;;  %2095 = vmatpush1.bf16.msra.mxu0 %v3577_v18  ;;  %v3636_v17 = vld [vmem:[%s5056_s12 + $0x74] ss:$8 sps:$4 sm:$0xff]   ;;  %v3634_v18 = vld [vmem:[%s5056_s12 + $0x70] ss:$8 sps:$4 sm:$0xff]  }
 0x260   :  { %2096 = vmatprep.subr.bf16.mxu0 %v3582_v19  ;;  %v3639_v19 = vld [vmem:[%s5056_s12 + $0x84] ss:$8 sps:$4 sm:$0xff]  }
 0x262   :  { %1844 = vmatpush1.bf16.msra.mxu1 %v3532_v20  ;;  %v3637_v20 = vld [vmem:[%s5056_s12 + $0x80] ss:$8 sps:$4 sm:$0xff]  }
 0x263   :  { %1845 = vmatprep.subr.bf16.mxu1 %v3537_v21  ;;  %2097 = vmatpush1.bf16.msra.mxu0 %v3580_v22  ;;  %v3642_v21 = vld [vmem:[%s5056_s12 + $0x94] ss:$8 sps:$4 sm:$0xff]   ;;  %v3640_v22 = vld [vmem:[%s5056_s12 + $0x90] ss:$8 sps:$4 sm:$0xff]  }
 0x264   :  { %2098 = vmatprep.subr.bf16.mxu0 %v3585_v23  ;;  %v3645_v23 = vld [vmem:[%s5056_s12 + $0xa4] ss:$8 sps:$4 sm:$0xff]  }
 0x266   :  { %1846 = vmatpush1.bf16.msra.mxu1 %v3535_v24  ;;  %v3643_v24 = vld [vmem:[%s5056_s12 + $0xa0] ss:$8 sps:$4 sm:$0xff]  }
 0x267   :  { %1847 = vmatprep.subr.bf16.mxu1 %v3540_v25  ;;  %2099 = vmatpush1.bf16.msra.mxu0 %v3583_v26  ;;  %v3648_v25 = vld [vmem:[%s5056_s12 + $0xb4] ss:$8 sps:$4 sm:$0xff]   ;;  %v3646_v26 = vld [vmem:[%s5056_s12 + $0xb0] ss:$8 sps:$4 sm:$0xff]  }
 0x268   :  { %2100 = vmatprep.subr.bf16.mxu0 %v3588_v27  ;;  %v3651_v27 = vld [vmem:[%s5056_s12 + $0xc4] ss:$8 sps:$4 sm:$0xff]  }
 0x26a   :  { %1848 = vmatpush1.bf16.msra.mxu1 %v3538_v28  ;;  %v3649_v28 = vld [vmem:[%s5056_s12 + $0xc0] ss:$8 sps:$4 sm:$0xff]  }
 0x26b   :  { %1849 = vmatprep.subr.bf16.mxu1 %v3543_v29  ;;  %2101 = vmatpush1.bf16.msra.mxu0 %v3586_v30  ;;  %v3654_v29 = vld [vmem:[%s5056_s12 + $0xd4] ss:$8 sps:$4 sm:$0xff]   ;;  %v3652_v30 = vld [vmem:[%s5056_s12 + $0xd0] ss:$8 sps:$4 sm:$0xff]  }
 0x26c   :  { %2102 = vmatprep.subr.bf16.mxu0 %v3591_v31  ;;  %v3657_v31 = vld [vmem:[%s5056_s12 + $0xe4] ss:$8 sps:$4 sm:$0xff]  }
 0x26e   :  { %1850 = vmatpush1.bf16.msra.mxu1 %v3541_v32  ;;  %v3655_v32 = vld [vmem:[%s5056_s12 + $0xe0] ss:$8 sps:$4 sm:$0xff]  }
 0x26f   :  { %1851 = vmatprep.subr.bf16.mxu1 %v3546_v33  ;;  %2103 = vmatpush1.bf16.msra.mxu0 %v3589_v34  ;;  %v3660_v33 = vld [vmem:[%s5056_s12 + $0xf4] ss:$8 sps:$4 sm:$0xff]   ;;  %v3658_v34 = vld [vmem:[%s5056_s12 + $0xf0] ss:$8 sps:$4 sm:$0xff]  }
 0x270   :  { %2104 = vmatprep.subr.bf16.mxu0 %v3594_v35  ;;  %v3663_v35 = vld [vmem:[%s5056_s12 + $0x104] ss:$8 sps:$4 sm:$0xff]  }
 0x272   :  { %1852 = vmatpush1.bf16.msra.mxu1 %v3544_v36  ;;  %v703_v36 = vld [vmem:[%s5051_s7] sm:$0x3] }
 0x273   :  { %1853 = vmatprep.subr.bf16.mxu1 %v3549_v37  ;;  %2105 = vmatpush1.bf16.msra.mxu0 %v3592_v38  ;;  %v708_v37 = vrot.slane %v703_v36, %v4278_v10  ;;  %v712_v38 = vrot.slane %v703_v36, %v4287_v13 }
 0x274   :  { %2106 = vmatprep.subr.bf16.mxu0 %v3597_v39 }
 0x276   :  { %1854 = vmatpush1.bf16.msra.mxu1 %v3547_v41 }
 0x277   :  { %1855 = vmatprep.subr.bf16.mxu1 %v3552_v42  ;;  %2107 = vmatpush1.bf16.msra.mxu0 %v3595_v43 }
 0x278   :  { %2108 = vmatprep.subr.bf16.mxu0 %v3600_v44 }
 0x27a   :  { %1856 = vmatpush1.bf16.msra.mxu1 %v3550_v45 }
 0x27b   :  { %1857 = vmatprep.subr.bf16.mxu1 %v3555_v46  ;;  %2109 = vmatpush1.bf16.msra.mxu0 %v3598_v47 }
 0x27c   :  { %2110 = vmatprep.subr.bf16.mxu0 %v3603_v48 }
 0x27e   :  { %1858 = vmatpush1.bf16.msra.mxu1 %v3553_v49 }
 0x27f   :  { %1859 = vmatprep.subr.bf16.mxu1 %v3558_v12  ;;  %2111 = vmatpush1.bf16.msra.mxu0 %v3601_v50  ;;  %v4804_v12 = vld [vmem:[%s5053_s9] sm:$0xf] }
 0x280   :  { %2112 = vmatprep.subr.bf16.mxu0 %v3606_v51  ;;  %v1053_v50 = vrot.slane %v4804_v12, %v4278_v10  ;;  %v1057_v51 = vrot.slane %v4804_v12, %v4287_v13 }
 0x282   :  { %1860 = vmatpush1.bf16.msra.mxu1 %v3556_v52 }
 0x283   :  { %1861 = vmatprep.subr.bf16.mxu1 %v3561_v53  ;;  %2113 = vmatpush1.bf16.msra.mxu0 %v3604_v54 }
 0x284   :  { %2114 = vmatprep.subr.bf16.mxu0 %v3609_v55 }
 0x286   :  { %1862 = vmatpush1.bf16.msra.mxu1 %v3559_v56 }
 0x287   :  { %1863 = vmatprep.subr.bf16.mxu1 %v3564_v57  ;;  %2115 = vmatpush1.bf16.msra.mxu0 %v3607_v58 }
 0x288   :  { %2116 = vmatprep.subr.bf16.mxu0 %v3612_v60 }
 0x28a   :  { %1864 = vmatpush1.bf16.msra.mxu1 %v3562_v61 }
 0x28b   :  { %2117 = vmatpush1.bf16.msra.mxu0 %v3610_v62  ;;  %2523 = vmatprep.subr.bf16.mxu1 %v3615_v63  ;;  %v3661_v62 = vld [vmem:[%s5056_s12 + $0x100] ss:$8 sps:$4 sm:$0xff]  }
 0x28d   :  { %1866 = vmatmul.mubr.bf16.vlgmr.msra.gmra.mrb[8].mxu1 %v4508_v59  ;;  %v3624_v59 = vld [vmem:[%s5056_s12 + $0x34] ss:$8 sps:$4 sm:$0xff]  }
 0x28e   :  { %2524 = vmatpush1.bf16.msra.mxu1 %v3613_v1  ;;  %v3666_v1 = vld [vmem:[%s5056_s12 + $0x114] ss:$8 sps:$4 sm:$0xff]  }
 0x28f   :  { %2525 = vmatprep.subr.bf16.mxu1 %v3618_v2  ;;  %v3664_v2 = vld [vmem:[%s5056_s12 + $0x110] ss:$8 sps:$4 sm:$0xff]  }
 0x292   :  { %2526 = vmatpush1.bf16.msra.mxu1 %v3616_v40  ;;  %v3669_v40 = vld [vmem:[%s5056_s12 + $0x124] ss:$8 sps:$4 sm:$0xff]  }
 0x293   :  { %2527 = vmatprep.subr.bf16.mxu1 %v3621_v0  ;;  %v3667_v0 = vld [vmem:[%s5056_s12 + $0x120] ss:$8 sps:$4 sm:$0xff]  }
 0x296   :  { %2528 = vmatpush1.bf16.msra.mxu1 %v3619_v3  ;;  %v3672_v3 = vld [vmem:[%s5056_s12 + $0x134] ss:$8 sps:$4 sm:$0xff]  }
 0x297   :  { %2529 = vmatprep.subr.bf16.mxu1 %v3624_v59  ;;  %v3670_v59 = vld [vmem:[%s5056_s12 + $0x130] ss:$8 sps:$4 sm:$0xff]  }
 0x29a   :  { %2530 = vmatpush1.bf16.msra.mxu1 %v3622_v4  ;;  %v3675_v4 = vld [vmem:[%s5056_s12 + $0x144] ss:$8 sps:$4 sm:$0xff]  }
 0x29b   :  { %2531 = vmatprep.subr.bf16.mxu1 %v3627_v5  ;;  %v3673_v5 = vld [vmem:[%s5056_s12 + $0x140] ss:$8 sps:$4 sm:$0xff]  }
 0x29e   :  { %2532 = vmatpush1.bf16.msra.mxu1 %v3625_v6  ;;  %v3678_v6 = vld [vmem:[%s5056_s12 + $0x154] ss:$8 sps:$4 sm:$0xff]  }
 0x29f   :  { %2533 = vmatprep.subr.bf16.mxu1 %v3630_v7  ;;  %v3676_v7 = vld [vmem:[%s5056_s12 + $0x150] ss:$8 sps:$4 sm:$0xff]  }
 0x2a2   :  { %2534 = vmatpush1.bf16.msra.mxu1 %v3628_v8  ;;  %v3681_v8 = vld [vmem:[%s5056_s12 + $0x164] ss:$8 sps:$4 sm:$0xff]  }
 0x2a3   :  { %2535 = vmatprep.subr.bf16.mxu1 %v3633_v15  ;;  %v3679_v15 = vld [vmem:[%s5056_s12 + $0x160] ss:$8 sps:$4 sm:$0xff]  }
 0x2a6   :  { %2536 = vmatpush1.bf16.msra.mxu1 %v3631_v16  ;;  %v3684_v16 = vld [vmem:[%s5056_s12 + $0x174] ss:$8 sps:$4 sm:$0xff]  }
 0x2a7   :  { %2537 = vmatprep.subr.bf16.mxu1 %v3636_v17  ;;  %v3682_v17 = vld [vmem:[%s5056_s12 + $0x170] ss:$8 sps:$4 sm:$0xff]  }
 0x2aa   :  { %2538 = vmatpush1.bf16.msra.mxu1 %v3634_v18  ;;  %v3687_v18 = vld [vmem:[%s5056_s12 + $0x184] ss:$8 sps:$4 sm:$0xff]  }
 0x2ab   :  { %2539 = vmatprep.subr.bf16.mxu1 %v3639_v19  ;;  %v3685_v19 = vld [vmem:[%s5056_s12 + $0x180] ss:$8 sps:$4 sm:$0xff]  }
 0x2ae   :  { %2540 = vmatpush1.bf16.msra.mxu1 %v3637_v20  ;;  %v3690_v20 = vld [vmem:[%s5056_s12 + $0x194] ss:$8 sps:$4 sm:$0xff]  }
 0x2af   :  { %2541 = vmatprep.subr.bf16.mxu1 %v3642_v21  ;;  %v3688_v21 = vld [vmem:[%s5056_s12 + $0x190] ss:$8 sps:$4 sm:$0xff]  }
 0x2b2   :  { %2542 = vmatpush1.bf16.msra.mxu1 %v3640_v22  ;;  %v3693_v22 = vld [vmem:[%s5056_s12 + $0x1a4] ss:$8 sps:$4 sm:$0xff]  }
 0x2b3   :  { %2543 = vmatprep.subr.bf16.mxu1 %v3645_v23  ;;  %v3691_v23 = vld [vmem:[%s5056_s12 + $0x1a0] ss:$8 sps:$4 sm:$0xff]  }
 0x2b6   :  { %2544 = vmatpush1.bf16.msra.mxu1 %v3643_v24  ;;  %v3696_v24 = vld [vmem:[%s5056_s12 + $0x1b4] ss:$8 sps:$4 sm:$0xff]  }
 0x2b7   :  { %2545 = vmatprep.subr.bf16.mxu1 %v3648_v25  ;;  %v3694_v25 = vld [vmem:[%s5056_s12 + $0x1b0] ss:$8 sps:$4 sm:$0xff]  }
 0x2ba   :  { %2546 = vmatpush1.bf16.msra.mxu1 %v3646_v26  ;;  %v3699_v26 = vld [vmem:[%s5056_s12 + $0x1c4] ss:$8 sps:$4 sm:$0xff]  }
 0x2bb   :  { %2547 = vmatprep.subr.bf16.mxu1 %v3651_v27  ;;  %v3697_v27 = vld [vmem:[%s5056_s12 + $0x1c0] ss:$8 sps:$4 sm:$0xff]  }
 0x2be   :  { %2548 = vmatpush1.bf16.msra.mxu1 %v3649_v28  ;;  %v3702_v28 = vld [vmem:[%s5056_s12 + $0x1d4] ss:$8 sps:$4 sm:$0xff]  }
 0x2bf   :  { %2549 = vmatprep.subr.bf16.mxu1 %v3654_v29  ;;  %v3700_v29 = vld [vmem:[%s5056_s12 + $0x1d0] ss:$8 sps:$4 sm:$0xff]  }
 0x2c2   :  { %2550 = vmatpush1.bf16.msra.mxu1 %v3652_v30  ;;  %v3705_v30 = vld [vmem:[%s5056_s12 + $0x1e4] ss:$8 sps:$4 sm:$0xff]  }
 0x2c3   :  { %2551 = vmatprep.subr.bf16.mxu1 %v3657_v31  ;;  %v1061_v31 = vrot.slane %v4804_v12, %v276_v11 }
 0x2c6   :  { %2552 = vmatpush1.bf16.msra.mxu1 %v3655_v32  ;;  %v1065_v32 = vrot.slane %v4804_v12, %v280_v14 }
 0x2c7   :  { %2553 = vmatprep.subr.bf16.mxu1 %v3660_v33  ;;  %v3703_v33 = vld [vmem:[%s5056_s12 + $0x1e0] ss:$8 sps:$4 sm:$0xff]  }
 0x2ca   :  { %2554 = vmatpush1.bf16.msra.mxu1 %v3658_v34  ;;  %v3708_v34 = vld [vmem:[%s5056_s12 + $0x1f4] ss:$8 sps:$4 sm:$0xff]  }
 0x2cb   :  { %2564 = vmatprep.subr.bf16.mxu1 %v3663_v35 }
 0x2e0   :  { %v909_v39 = vpop.f32.mrb[4].mxu1 }
 0x2e1   :  { %v910_v41 = vadd.f32 %v909_v39, %v708_v37  ;;  %v911_v42 = vpop.f32.mrb[5].mxu1 }
 0x2e2   :  { %v912_v43 = vadd.f32 %v911_v42, %v712_v38  ;;  %v913_v44 = vpop.f32.mrb[6].mxu1 }
 0x2e3   :  { %v916_v45 = vmax.f32 %v910_v41, 0.0  ;;  %v914_v46 = vpop.f32.mrb[7].mxu1  ;;  %v1914_v44 = vld [vmem:[%s5055_s11] sm:$0x3] }
 0x2e4   :  { %v917_v47 = vmax.f32 %v912_v43, 0.0  ;;  %v1923_v46 = vrot.slane %v1914_v44, %v4287_v13 }
 0x2e5   :  { %v918_v49 = vpack.c.bf16 %v916_v45, %v916_v45  ;;  %v1919_v45 = vrot.slane %v1914_v44, %v4278_v10 }
 0x2e6   :  { %v919_v48 = vpack.c.bf16 %v917_v47, %v917_v47 }
 0x2e8   :  { %2118 = vmatprep.mubr.bf16.mxu0 %v919_v48 }
 0x2e9   :  { %2119 = vmatmul.mubr.bf16.vlgmr.msra.gmra.mrb[16].mxu0 %v918_v49 }
 0x320   :  { %v1785_v52 = vpop.f32.mrb[12].mxu0 }
 0x321   :  { %v3215_v53 = vadd.f32 %v1785_v52, %v1053_v50  ;;  %v1787_v54 = vpop.f32.mrb[13].mxu0  ;;  %v3711_v52 = vld [vmem:[%s5058_s14 + $0x4] ss:$8 sps:$4 sm:$0xff]  }
 0x322   :  { %v3216_v55 = vadd.f32 %v1787_v54, %v1057_v51  ;;  %v1789_v56 = vpop.f32.mrb[14].mxu0  ;;  %2785 = vmatprep.subr.bf16.mxu0 %v3711_v52  ;;  %v3714_v54 = vld [vmem:[%s5058_s14 + $0x14] ss:$8 sps:$4 sm:$0xff]  }
 0x323   :  { %v1874_v57 = vmax.f32 %v3215_v53, 0.0  ;;  %v1790_v58 = vpop.f32.mrb[15].mxu0  ;;  %v3709_v53 = vld [vmem:[%s5058_s14] ss:$8 sps:$4 sm:$0xff]   ;;  %v3717_v56 = vld [vmem:[%s5058_s14 + $0x24] ss:$8 sps:$4 sm:$0xff]  }
 0x324   :  { %v1875_v60 = vmax.f32 %v3216_v55, 0.0  ;;  %2786 = vmatpush1.bf16.msra.mxu0 %v3709_v53  ;;  %v3712_v55 = vld [vmem:[%s5058_s14 + $0x10] ss:$8 sps:$4 sm:$0xff]   ;;  %v3720_v58 = vld [vmem:[%s5058_s14 + $0x34] ss:$8 sps:$4 sm:$0xff]  }
 0x325   :  { %v1878_v63 = vpack.c.bf16 %v1874_v57, %v1874_v57  ;;  %2787 = vmatprep.subr.bf16.mxu0 %v3714_v54  ;;  %v3715_v57 = vld [vmem:[%s5058_s14 + $0x20] ss:$8 sps:$4 sm:$0xff]  }
 0x326   :  { %v1879_v61 = vpack.c.bf16 %v1875_v60, %v1875_v60  ;;  %v3718_v60 = vld [vmem:[%s5058_s14 + $0x30] ss:$8 sps:$4 sm:$0xff]  }
 0x328   :  { %2555 = vmatprep.mubr.bf16.mxu1 %v1879_v61  ;;  %2788 = vmatpush1.bf16.msra.mxu0 %v3712_v55  ;;  %v3723_v61 = vld [vmem:[%s5058_s14 + $0x44] ss:$8 sps:$4 sm:$0xff]  }
 0x329   :  { %2556 = vmatmul.mubr.bf16.vlgmr.msra.gmra.mrb[12].mxu1 %v1878_v63  ;;  %2789 = vmatprep.subr.bf16.mxu0 %v3717_v56  ;;  %v3726_v63 = vld [vmem:[%s5058_s14 + $0x54] ss:$8 sps:$4 sm:$0xff]  }
 0x32a   :  { %2565 = vmatpush1.bf16.msra.mxu1 %v3661_v62  ;;  %v3721_v62 = vld [vmem:[%s5058_s14 + $0x40] ss:$8 sps:$4 sm:$0xff]  }
 0x32b   :  { %2566 = vmatprep.subr.bf16.mxu1 %v3666_v1  ;;  %v3724_v1 = vld [vmem:[%s5058_s14 + $0x50] ss:$8 sps:$4 sm:$0xff]  }
 0x32c   :  { %2790 = vmatpush1.bf16.msra.mxu0 %v3715_v57 }
 0x32d   :  { %2791 = vmatprep.subr.bf16.mxu0 %v3720_v58 }
 0x32e   :  { %2567 = vmatpush1.bf16.msra.mxu1 %v3664_v2  ;;  %v3729_v2 = vld [vmem:[%s5058_s14 + $0x64] ss:$8 sps:$4 sm:$0xff]  }
 0x32f   :  { %2568 = vmatprep.subr.bf16.mxu1 %v3669_v40  ;;  %v3727_v40 = vld [vmem:[%s5058_s14 + $0x60] ss:$8 sps:$4 sm:$0xff]  }
 0x330   :  { %2792 = vmatpush1.bf16.msra.mxu0 %v3718_v60 }
 0x331   :  { %2793 = vmatprep.subr.bf16.mxu0 %v3723_v61 }
 0x332   :  { %2569 = vmatpush1.bf16.msra.mxu1 %v3667_v0  ;;  %v3730_v0 = vld [vmem:[%s5058_s14 + $0x70] ss:$8 sps:$4 sm:$0xff]  }
 0x333   :  { %2570 = vmatprep.subr.bf16.mxu1 %v3672_v3  ;;  %v3732_v3 = vld [vmem:[%s5058_s14 + $0x74] ss:$8 sps:$4 sm:$0xff]  }
 0x334   :  { %2794 = vmatpush1.bf16.msra.mxu0 %v3721_v62 }
 0x335   :  { %2795 = vmatprep.subr.bf16.mxu0 %v3726_v63 }
 0x336   :  { %2571 = vmatpush1.bf16.msra.mxu1 %v3670_v59  ;;  %v3735_v59 = vld [vmem:[%s5058_s14 + $0x84] ss:$8 sps:$4 sm:$0xff]  }
 0x337   :  { %2572 = vmatprep.subr.bf16.mxu1 %v3675_v4  ;;  %v3733_v4 = vld [vmem:[%s5058_s14 + $0x80] ss:$8 sps:$4 sm:$0xff]  }
 0x338   :  { %2796 = vmatpush1.bf16.msra.mxu0 %v3724_v1 }
 0x339   :  { %2797 = vmatprep.subr.bf16.mxu0 %v3729_v2 }
 0x33a   :  { %2573 = vmatpush1.bf16.msra.mxu1 %v3673_v5  ;;  %v3738_v5 = vld [vmem:[%s5058_s14 + $0x94] ss:$8 sps:$4 sm:$0xff]  }
 0x33b   :  { %2574 = vmatprep.subr.bf16.mxu1 %v3678_v6  ;;  %v3741_v6 = vld [vmem:[%s5058_s14 + $0xa4] ss:$8 sps:$4 sm:$0x1f]  }
 0x33c   :  { %2798 = vmatpush1.bf16.msra.mxu0 %v3727_v40 }
 0x33d   :  { %2799 = vmatprep.subr.bf16.mxu0 %v3732_v3 }
 0x33e   :  { %2575 = vmatpush1.bf16.msra.mxu1 %v3676_v7  ;;  %v3879_v7 = vmov 65535  }
 0x33f   :  { %2576 = vmatprep.subr.bf16.mxu1 %v3681_v8  ;;  %v2777_v8 = vsel %vm2775_vm2, 4294967295, %v3879_v7 }
 0x340   :  { %2800 = vmatpush1.bf16.msra.mxu0 %v3730_v0 }
 0x341   :  { %2801 = vmatprep.subr.bf16.mxu0 %v3735_v59 }
 0x342   :  { %2577 = vmatpush1.bf16.msra.mxu1 %v3679_v15  ;;  %v2778_v15 = vsel %vm2776_vm3, %v2777_v8, 0 }
 0x343   :  { %2578 = vmatprep.subr.bf16.mxu1 %v3684_v16  ;;  %v3736_v16 = vld [vmem:[%s5058_s14 + $0x90] ss:$8 sps:$4 sm:$0xff]  }
 0x344   :  { %2802 = vmatpush1.bf16.msra.mxu0 %v3733_v4 }
 0x345   :  { %2803 = vmatprep.subr.bf16.mxu0 %v3738_v5 }
 0x346   :  { %2579 = vmatpush1.bf16.msra.mxu1 %v3682_v17  ;;  %v3739_v17 = vld [vmem:[%s5058_s14 + $0xa0] ss:$8 sps:$4 sm:$0x1f]  }
 0x347   :  { %2580 = vmatprep.subr.bf16.mxu1 %v3687_v18  ;;  %v2783_v18 = vand.u32 %v3741_v6, %v2778_v15 }
 0x348   :  { %2804 = vmatpush1.bf16.msra.mxu0 %v3736_v16 }
 0x349   :  { %2805 = vmatprep.subr.bf16.mxu0 %v2783_v18 }
 0x34a   :  { %2581 = vmatpush1.bf16.msra.mxu1 %v3685_v19  ;;  %v2780_v19 = vand.u32 %v3739_v17, %v2778_v15 }
 0x34b   :  { %2582 = vmatprep.subr.bf16.mxu1 %v3690_v20  ;;  %v2191_v20 = vld [vmem:[%s5057_s13] sm:$0x3] }
 0x34c   :  { %2806 = vmatpush1.bf16.msra.mxu0 %v2780_v19 }
 0x34e   :  { %2583 = vmatpush1.bf16.msra.mxu1 %v3688_v21  ;;  %v2196_v21 = vrot.slane %v2191_v20, %v4278_v10 }
 0x34f   :  { %2584 = vmatprep.subr.bf16.mxu1 %v3693_v22  ;;  %v2200_v22 = vrot.slane %v2191_v20, %v4287_v13 }
 0x352   :  { %2585 = vmatpush1.bf16.msra.mxu1 %v3691_v23 }
 0x353   :  { %2586 = vmatprep.subr.bf16.mxu1 %v3696_v24 }
 0x356   :  { %2587 = vmatpush1.bf16.msra.mxu1 %v3694_v25 }
 0x357   :  { %2588 = vmatprep.subr.bf16.mxu1 %v3699_v26 }
 0x35a   :  { %2589 = vmatpush1.bf16.msra.mxu1 %v3697_v27 }
 0x35b   :  { %2590 = vmatprep.subr.bf16.mxu1 %v3702_v28 }
 0x35e   :  { %2591 = vmatpush1.bf16.msra.mxu1 %v3700_v29 }
 0x35f   :  { %2592 = vmatprep.subr.bf16.mxu1 %v3705_v30 }
 0x360   :  { %v1867_v35 = vpop.f32.mrb[8].mxu1 }
 0x361   :  { %v3217_v36 = vadd.f32 %v1867_v35, %v1061_v31  ;;  %v1869_v37 = vpop.f32.mrb[9].mxu1 }
 0x362   :  { %v3218_v38 = vadd.f32 %v1869_v37, %v1065_v32  ;;  %v1871_v39 = vpop.f32.mrb[10].mxu1  ;;  %2593 = vmatpush1.bf16.msra.mxu1 %v3703_v33 }
 0x363   :  { %v1876_v11 = vmax.f32 %v3217_v36, 0.0  ;;  %v1872_v14 = vpop.f32.mrb[11].mxu1  ;;  %2594 = vmatprep.subr.bf16.mxu1 %v3708_v34  ;;  %v2621_v39 = vld [vmem:[%s5073_s2] sm:$0xff] }
 0x364   :  { %v1877_v41 = vmax.f32 %v3218_v38, 0.0 }
 0x365   :  { %v1880_v43 = vpack.c.bf16 %v1876_v11, %v1876_v11 }
 0x366   :  { %v1881_v42 = vpack.c.bf16 %v1877_v41, %v1877_v41  ;;  %2595 = vmatpush1.bf16.msra.mxu1 %v3706_v9  ;;  %v2622_v9 = vld [vmem:[%s5073_s2 + $0x8] sm:$0xff] }
 0x368   :  { %2596 = vmatprep.mubr.bf16.mxu1 %v1881_v42 }
 0x369   :  { %2597 = vmatmul.mubr.bf16.vlgmr.msra.gmra.mrb[12].mxu1 %v1880_v43 }
 0x3bc   :  { %v2120_v47 = vpop.f32.mrb[16].mxu0 }
 0x3bd   :  { %v4914_v48 = vadd.f32 %v2120_v47, %v1919_v45  ;;  %v2122_v49 = vpop.f32.mrb[17].mxu0 }
 0x3be   :  { %v4916_v12 = vadd.f32 %v2122_v49, %v1923_v46  ;;  %v2124_v50 = vpop.f32.mrb[18].mxu0 }
 0x3bf   :  { %2828 = vst [vmem:[#allocation8] sm:$0xff] %v4914_v48  ;;  %v2125_v51 = vpop.f32.mrb[19].mxu0 }
 0x3c0   :  { %2829 = vst.msk [vmem:[#allocation8 + $0x8] sm:$0xff] %vm2771_vm1, %v4916_v12 }
 0x43c   :  { %v2598_v23 = vpop.f32.mrb[12].mxu1 }
 0x43d   :  { %v3219_v24 = vadd.f32 %v2598_v23, %v2196_v21  ;;  %v2600_v25 = vpop.f32.mrb[13].mxu1 }
 0x43e   :  { %v3220_v26 = vadd.f32 %v2600_v25, %v2200_v22  ;;  %v2602_v27 = vpop.f32.mrb[14].mxu1 }
 0x43f   :  { %v2605_v28 = vmul.f32 1.442695, %v3219_v24  ;;  %2830 = vst [vmem:[#allocation10] sm:$0xff] %v3219_v24  ;;  %v2603_v29 = vpop.f32.mrb[15].mxu1 }
 0x440   :  { %v2607_v30 = vmul.f32 1.442695, %v3220_v26  ;;  %2831 = vst.msk [vmem:[#allocation10 + $0x8] sm:$0xff] %vm2771_vm1, %v3220_v26 }
 0x441   :  { %3742 = vpow2.f32 %v2605_v28 }
 0x442   :  { %3744 = vpow2.f32 %v2607_v30 }
 0x44b   :  { %v3743_v31 = vpop.eup %3742 }
 0x44c   :  { %v3745_v32 = vpop.eup %3744  ;;  %v3190_v33 = vmul.f32 -1.442695, %v3743_v31 }
 0x44d   :  { %v3191_v34 = vmul.f32 -1.442695, %v3745_v32 }
 0x44e   :  { %3746 = vpow2.f32 %v3190_v33 }
 0x44f   :  { %3748 = vpow2.f32 %v3191_v34 }
 0x458   :  { %v3747_v35 = vpop.eup %3746 }
 0x459   :  { %v3749_v36 = vpop.eup %3748  ;;  %v2615_v37 = vadd.f32 1.0, %v3747_v35 }
 0x45a   :  { %v2616_v38 = vadd.f32 1.0, %v3749_v36 }
 0x45b   :  { %3750 = vrcp.f32 %v2615_v37 }
 0x45c   :  { %3752 = vrcp.f32 %v2616_v38 }
 0x465   :  { %v3751_v11 = vpop.eup %3750 }
 0x466   :  { %v3753_v14 = vpop.eup %3752  ;;  %v2623_v41 = vmul.f32 %v3751_v11, %v2621_v39 }
 0x467   :  { %v2624_v42 = vmul.f32 %v3753_v14, %v2622_v9 }
 0x468   :  { %v2625_v43 = vadd.f32 %v2623_v41, %v4914_v48 }
 0x469   :  { %v2626_v44 = vadd.f32 %v2624_v42, %v4916_v12 }
 0x46a   :  { %v2627_v46 = vpack.c.bf16 %v2625_v43, %v2625_v43 }
 0x46b   :  { %v2628_v45 = vpack.c.bf16 %v2626_v44, %v2626_v44 }
 0x46d   :  { %3214 = vmatprep.mubr.msk.bf16.mxu0 %vm2771_vm1, %v2628_v45 }
 0x46e   :  { %2818 = vmatmul.mubr.bf16.vlgmr.msra.gmra.mrb[20].mxu0 %v2627_v46 }
 0x46f   :  { %3809 = shalt.err (!%p3806_p6)
}
 0x470   :  { %s3810_s11 = scalar_lea.hbm %s5061_s17, 256 }
 0x471   :  { %p3811_p7 = scmp.ne.s32.totalorder %s5061_s17, %s3810_s11  ;;  %p3814_p8 = scmp.lt.u32.totalorder %s3810_s11, %s5061_s17 }
 0x473   :  { %p3816_p9 = pnand %p3814_p8, %p3811_p7 }
 0x475   :  { %3819 = shalt.err (!%p3816_p9)
}
 0x476   :  { %2851 = dma.vmem_to_hbm [thread:$0]  %s2849_s24, 256, %s5061_s17, [#allocation9]  }
 0x477   :  { %s3881_s19 = smov [#allocation10]  }
 0x478   :  { %s2858_s7 = sshll.u32 %s3881_s19, 4  ;;  %s2859_s7 = int_to_ptr.vmem [resolvable:$true] %s2858_s7 }
 0x479   :  { %s3820_s1 = scalar_lea.vmem %s2859_s7, 256  ;;  %p3825_p11 = scmp.lt.s32.totalorder %s2859_s7, %s2859_s7 }
 0x47a   :  { %p3821_p10 = scmp.ne.s32.totalorder %s2859_s7, %s3820_s1  ;;  %p3826_p12 = scmp.lt.s32.totalorder %s3820_s1, %s3820_s1 }
 0x47c   :  { %p3827_p13 = por %p3826_p12, %p3825_p11 }
 0x47e   :  { %p3828_p0 = pnand %p3827_p13, %p3821_p10 }
 0x480   :  { %3831 = shalt.err (!%p3828_p0)
}
 0x481   :  { %s3832_s10 = scalar_lea.hbm %s5062_s18, 256 }
 0x482   :  { %p3833_p1 = scmp.ne.s32.totalorder %s5062_s18, %s3832_s10  ;;  %p3836_p2 = scmp.lt.u32.totalorder %s3832_s10, %s5062_s18 }
 0x484   :  { %p3838_p3 = pnand %p3836_p2, %p3833_p1 }
 0x486   :  { %3841 = shalt.err (!%p3838_p3)
}
 0x487   :  { %2861 = dma.vmem_to_hbm [thread:$0]  %s2859_s7, 256, %s5062_s18, [#allocation9]   ;;  %v2651_v47 = vld [vmem:[%s5059_s15] sm:$0x3] }
 0x488   :  { %v2656_v48 = vrot.slane %v2651_v47, %v4278_v10  ;;  %v2660_v49 = vrot.slane %v2651_v47, %v4287_v13  ;;  %s3882_s2 = smov [#allocation7]  }
 0x489   :  { %s2838_s28 = sshll.u32 %s3882_s2, 4  ;;  %s2839_s28 = int_to_ptr.vmem [resolvable:$true] %s2838_s28 }
 0x48a   :  { %s3842_s18 = scalar_lea.vmem %s2839_s28, 256  ;;  %p3847_p5 = scmp.lt.s32.totalorder %s2839_s28, %s2839_s28 }
 0x48b   :  { %p3843_p4 = scmp.ne.s32.totalorder %s2839_s28, %s3842_s18  ;;  %p3848_p6 = scmp.lt.s32.totalorder %s3842_s18, %s3842_s18 }
 0x48d   :  { %p3849_p7 = por %p3848_p6, %p3847_p5 }
 0x48f   :  { %p3850_p8 = pnand %p3849_p7, %p3843_p4 }
 0x541   :  { %v2819_v12 = vpop.f32.mrb[20].mxu0 }
 0x542   :  { %v2820_v50 = vadd.f32 %v2819_v12, %v2656_v48  ;;  %v2821_v51 = vpop.f32.mrb[21].mxu0 }
 0x543   :  { %v2822_v52 = vadd.f32 %v2821_v51, %v2660_v49  ;;  %v2823_v53 = vpop.f32.mrb[22].mxu0 }
 0x544   :  { %2826 = vst [vmem:[#allocation7] sm:$0xff] %v2820_v50  ;;  %v2824_v54 = vpop.f32.mrb[23].mxu0 }
 0x545   :  { %2827 = vst.msk [vmem:[#allocation7 + $0x8] sm:$0xff] %vm170_vm0, %v2822_v52 }
 0x546   :  { %3853 = shalt.err (!%p3850_p8)
}
 0x547   :  { %s5074_s23 = sld [smem:[#allocation18_spill]] }
 0x54d   :  { %s3854_s24 = scalar_lea.hbm %s5074_s23, 256 }
 0x54e   :  { %p3855_p9 = scmp.ne.s32.totalorder %s5074_s23, %s3854_s24  ;;  %p3858_p10 = scmp.lt.u32.totalorder %s3854_s24, %s5074_s23 }
 0x550   :  { %p3860_p11 = pnand %p3858_p10, %p3855_p9 }
 0x552   :  { %3863 = shalt.err (!%p3860_p11)
}
 0x553   :  { %2841 = dma.vmem_to_hbm [thread:$0]  %s2839_s28, 256, %s5074_s23, [#allocation4]  }
 0x554   :  { %3868 = dma.done.wait [#allocation4], 256  }
 0x555   :  { %3869 = vsyncadd [#allocation4], 4294967040 }
 0x556   :  { %3870 = dma.done.wait [#allocation9], 512  }
 0x557   :  { %3871 = vsyncadd [#allocation9], 4294966784 }
 0x558   :  { %2871 = vsyncpa [#allocation3], 1 }
 0x559   :  { %2872 = vsyncpa [#allocation6], 1 }
 0x55a   :  { %2873 = vsyncpa [#allocation4], 1 }
 0x55b   :  { %2874 = vsyncpa [#allocation9], 1 }

</bundles_post_ra>
